<compile_context>
chip_gen: v7x
topology: tpu7x:2x2x1
jax: 0.10.0
libtpu: 0.0.40
codegen_flags: <defaults>
</compile_context>

<pallas_src>
import functools

import jax
import jax.numpy as jnp
from jax.experimental import pallas as pl
from jax.experimental.pallas import tpu as pltpu


# ----------------------------------------------------------------------------
# Kernel 1: ConvTranspose2d(kernel=2, stride=2) as a single matmul per batch.
# ----------------------------------------------------------------------------
def _upsample_kernel(x_ref, w_ref, b_ref, o_ref):
    """x_ref: (1, Cin, H*W)  w_ref: (4*Cup, Cin)  b_ref: (4*Cup, 1)
    o_ref: (1, 4*Cup, H*W) with row r = (di*2+dj)*Cup + o (see wrapper)."""
    y = jnp.dot(w_ref[...], x_ref[0], preferred_element_type=jnp.float32)
    o_ref[0] = (y + b_ref[...]).astype(o_ref.dtype)


# ----------------------------------------------------------------------------
# Kernel 2: fused ResConvBlock (pre-act ReLU -> 3x3 -> ReLU -> 3x3 + 1x1 skip)
# ----------------------------------------------------------------------------
def _res_conv_block_kernel(cat_ref, mask_ref, w1_ref, b1_ref, w2_ref, b2_ref,
                           ws_ref, bs_ref, o_ref, *, padded_w):
    """Operates on a zero-padded flattened spatial layout of length Sp
    (multiple of 128).  cat_ref: (1, Ccat, Sp) with zero borders / zero tail.
    w1_ref: (9*Cout, Ccat), w2_ref: (9*Cout, Cout), ws_ref: (Cout, Ccat),
    biases: (Cout, 1), mask_ref: (1, Sp) interior mask."""
    cat = cat_ref[0]                       # (Ccat, Sp), zero border + zero tail
    sp = cat.shape[-1]
    cout = b1_ref.shape[0]
    x = jnp.maximum(cat, 0.0)              # full pre-activation ReLU
    interior = mask_ref[...]               # (1, Sp): 1.0 at valid pixels

    def conv3x3(inp, w_ref):
        # One stacked matmul for all 9 taps, then shift each tap's rows into
        # place with a lane roll (the spatial shift commutes with the channel
        # contraction).  Zero borders of `inp` provide the 'same' padding and
        # keep roll wrap-around away from interior outputs.
        z = jnp.dot(w_ref[...], inp, preferred_element_type=jnp.float32)
        acc = None
        for k in range(9):
            off = (k // 3 - 1) * padded_w + (k % 3 - 1)
            term = z[k * cout:(k + 1) * cout, :]       # sublane-aligned slice
            if off != 0:
                term = pltpu.roll(term, shift=(-off) % sp, axis=1)
            acc = term if acc is None else acc + term
        return acc

    t = jnp.maximum(conv3x3(x, w1_ref) + b1_ref[...], 0.0) * interior
    y = conv3x3(t, w2_ref) + b2_ref[...]
    y = y + jnp.dot(ws_ref[...], cat, preferred_element_type=jnp.float32) + bs_ref[...]
    o_ref[0] = y.astype(o_ref.dtype)


# ----------------------------------------------------------------------------
# BlockSpec helpers: batch-gridded (1, C, S) slabs + shared (full-array) blocks
# ----------------------------------------------------------------------------
def _batched3(c, s):
    return pl.BlockSpec((1, c, s), lambda b: (b, 0, 0))


def _shared2(r, c):
    return pl.BlockSpec((r, c), lambda b: (0, 0))


_PARALLEL = pltpu.CompilerParams(dimension_semantics=("parallel",))


# ----------------------------------------------------------------------------
# Wrapper-side layout plumbing (pure XLA pads / reshapes / transposes)
# ----------------------------------------------------------------------------
def _upsample_convtranspose2x2(x, w_t, b_t):
    """PyTorch ConvTranspose2d(Cin, Cup, kernel_size=2, stride=2) via Pallas.

    x: (B, Cin, H, W); w_t: (Cin, Cup, 2, 2); b_t: (Cup,) -> (B, Cup, 2H, 2W).
    """
    B, Cin, H, W = x.shape
    Cup = w_t.shape[1]
    S = H * W
    # Fold the 2x2 spatial offsets into the output-channel axis of one matmul:
    # row r = (di*2 + dj)*Cup + o  ->  out[b, o, 2h+di, 2w+dj]
    w_mat = jnp.transpose(w_t, (2, 3, 1, 0)).reshape(4 * Cup, Cin)
    b_mat = jnp.tile(b_t, 4).reshape(4 * Cup, 1)
    x2 = x.reshape(B, Cin, S)

    y = pl.pallas_call(
        _upsample_kernel,
        out_shape=jax.ShapeDtypeStruct((B, 4 * Cup, S), x.dtype),
        grid_spec=pltpu.PrefetchScalarGridSpec(
            num_scalar_prefetch=0,
            grid=(B,),
            in_specs=[
                _batched3(Cin, S),
                _shared2(4 * Cup, Cin),
                _shared2(4 * Cup, 1),
            ],
            out_specs=_batched3(4 * Cup, S),
        ),
        compiler_params=_PARALLEL,
    )(x2, w_mat, b_mat)

    # (B, (di, dj, o), (h, w)) -> (B, o, 2h+di, 2w+dj)   (layout plumbing in XLA)
    y = y.reshape(B, 2, 2, Cup, H, W)
    y = jnp.transpose(y, (0, 3, 4, 1, 5, 2))
    return y.reshape(B, Cup, 2 * H, 2 * W)


# ----------------------------------------------------------------------------
# ResUpBlock forward
# ----------------------------------------------------------------------------
def res_up_block(x, bridge, params):
    """ResUpBlock forward (up_mode='convtranspose', act='relu',
    batch_norm=None, dropout=0, k_size=3, skip_k_size=1)."""
    # TODO(synk): batch_norm / dropout / up_mode='upsampling' (bilinear) paths of
    # the PyTorch module are not implemented (disabled in this configuration).
    B = x.shape[0]
    up = _upsample_convtranspose2x2(x, params["up_w"], params["up_b"])
    cat = jnp.concatenate([up, bridge], axis=1)          # (B, Ccat, Ho, Wo)
    _, Ccat, Ho, Wo = cat.shape
    Hp, Wp = Ho + 2, Wo + 2
    Sp = Hp * Wp
    Sp_pad = ((Sp + 127) // 128) * 128                   # lane-dense length
    Cout = params["w1"].shape[0]

    # Zero-pad spatially (supplies 'same' padding inside the kernel), flatten,
    # and pad the flattened axis up to a multiple of 128.
    cat_p = jnp.pad(cat, ((0, 0), (0, 0), (1, 1), (1, 1))).reshape(B, Ccat, Sp)
    cat_p = jnp.pad(cat_p, ((0, 0), (0, 0), (0, Sp_pad - Sp)))

    # Interior mask: 1.0 at real pixels, 0.0 on the padded border / tail lanes.
    lane = jnp.arange(Sp_pad)
    lane_h, lane_w = lane // Wp, lane % Wp
    interior = ((lane_h >= 1) & (lane_h <= Ho) & (lane_w >= 1) & (lane_w <= Wo))
    interior = interior.astype(cat.dtype).reshape(1, Sp_pad)

    # Weight layout: row r = (kh*3 + kw)*Cout + o holds w[o, :, kh, kw].
    w1 = jnp.transpose(params["w1"], (2, 3, 0, 1)).reshape(9 * Cout, Ccat)
    w2 = jnp.transpose(params["w2"], (2, 3, 0, 1)).reshape(9 * Cout, Cout)
    b1 = params["b1"].reshape(Cout, 1)
    b2 = params["b2"].reshape(Cout, 1)
    ws = params["ws"].reshape(Cout, Ccat)
    bs = params["bs"].reshape(Cout, 1)

    kernel = functools.partial(_res_conv_block_kernel, padded_w=Wp)
    out_p = pl.pallas_call(
        kernel,
        out_shape=jax.ShapeDtypeStruct((B, Cout, Sp_pad), cat.dtype),
        grid_spec=pltpu.PrefetchScalarGridSpec(
            num_scalar_prefetch=0,
            grid=(B,),
            in_specs=[
                _batched3(Ccat, Sp_pad),        # cat (padded, flattened)
                _shared2(1, Sp_pad),            # interior mask
                _shared2(9 * Cout, Ccat),       # w1
                _shared2(Cout, 1),              # b1
                _shared2(9 * Cout, Cout),       # w2
                _shared2(Cout, 1),              # b2
                _shared2(Cout, Ccat),           # ws (1x1 shortcut)
                _shared2(Cout, 1),              # bs
            ],
            out_specs=_batched3(Cout, Sp_pad),
        ),
        compiler_params=_PARALLEL,
    )(cat_p, interior, w1, b1, w2, b2, ws, bs)

    out = out_p[:, :, :Sp].reshape(B, Cout, Hp, Wp)
    return out[:, :, 1:-1, 1:-1]


# ----------------------------------------------------------------------------
# Pure-JAX reference matching the PyTorch ResUpBlock forward
# ----------------------------------------------------------------------------
def res_up_block_ref(x, bridge, params):
    hi = jax.lax.Precision.HIGHEST
    B, Cin, H, W = x.shape
    w_t, b_t = params["up_w"], params["up_b"]
    Cup = w_t.shape[1]
    up = jnp.einsum("bchw,codk->bohdwk", x, w_t, precision=hi)
    up = up.reshape(B, Cup, 2 * H, 2 * W) + b_t[None, :, None, None]
    cat = jnp.concatenate([up, bridge], axis=1)

    def conv_same(v, w, b):
        y = jax.lax.conv_general_dilated(
            v, w, window_strides=(1, 1), padding="SAME",
            dimension_numbers=("NCHW", "OIHW", "NCHW"), precision=hi)
        return y + b[None, :, None, None]

    t = jax.nn.relu(cat)
    t = jax.nn.relu(conv_same(t, params["w1"], params["b1"]))
    t = conv_same(t, params["w2"], params["b2"])
    return t + conv_same(cat, params["ws"], params["bs"])


if __name__ == "__main__":
    # Small shapes consistent with the module: ndim=2, in_size=8, in_size_bridge=8,
    # out_size=8, k_size=3, input spatial 16x16 (-> 32x32 after the 2x upsample).
    B, Cin, H, W = 2, 8, 16, 16
    Cbridge, Cout = 8, 8
    Ccat = Cin + Cbridge

    key = jax.random.PRNGKey(0)
    ks = jax.random.split(key, 10)
    x = jax.random.normal(ks[0], (B, Cin, H, W), jnp.float32)
    bridge = jax.random.normal(ks[1], (B, Cbridge, 2 * H, 2 * W), jnp.float32)
    s = 0.2
    params = {
        "up_w": s * jax.random.normal(ks[2], (Cin, Cin, 2, 2), jnp.float32),  # ConvTranspose2d
        "up_b": s * jax.random.normal(ks[3], (Cin,), jnp.float32),
        "w1":   s * jax.random.normal(ks[4], (Cout, Ccat, 3, 3), jnp.float32),
        "b1":   s * jax.random.normal(ks[5], (Cout,), jnp.float32),
        "w2":   s * jax.random.normal(ks[6], (Cout, Cout, 3, 3), jnp.float32),
        "b2":   s * jax.random.normal(ks[7], (Cout,), jnp.float32),
        "ws":   s * jax.random.normal(ks[8], (Cout, Ccat, 1, 1), jnp.float32),  # 1x1 shortcut
        "bs":   s * jax.random.normal(ks[9], (Cout,), jnp.float32),
    }

    out = jax.jit(res_up_block)(x, bridge, params)
    out = jax.block_until_ready(out)

    ref = res_up_block_ref(x, bridge, params)
    assert out.shape == (B, Cout, 2 * H, 2 * W)
    err = float(jnp.max(jnp.abs(out - ref)))
    assert jnp.allclose(out, ref, atol=1e-3, rtol=1e-3), f"max abs err {err}"
    print("KERNEL_OK")
</pallas_src>

<mosaic_0001>
module attributes {stable_mosaic.version = 11 : i64} {
  func.func @_upsample_kernel(%arg0: i32, %arg1: memref<1x8x256xf32, #tpu.memory_space<vmem>>, %arg2: memref<32x8xf32, #tpu.memory_space<vmem>>, %arg3: memref<32x1xf32, #tpu.memory_space<vmem>>, %arg4: memref<1x32x256xf32, #tpu.memory_space<vmem>>) attributes {dimension_semantics = [#tpu.dimension_semantics<parallel>], iteration_bounds = array<i64: 2>, scalar_prefetch = 0 : i64, scratch_operands = 0 : i64, tpu.core_type = #tpu.core_type<tc>, window_params = [{transform_indices = @transform_0, window_bounds = array<i64: 1, 8, 256>}, {pipeline_mode = #tpu.pipeline_mode<synchronous>, transform_indices = @transform_1, window_bounds = array<i64: 32, 8>}, {pipeline_mode = #tpu.pipeline_mode<synchronous>, transform_indices = @transform_2, window_bounds = array<i64: 32, 1>}, {transform_indices = @transform_3, window_bounds = array<i64: 1, 32, 256>}]} {
    %c0 = arith.constant 0 : index
    %c0_0 = arith.constant 0 : index
    %0 = vector.load %arg2[%c0, %c0_0] : memref<32x8xf32, #tpu.memory_space<vmem>>, vector<32x8xf32>
    %c0_1 = arith.constant 0 : index
    %c0_2 = arith.constant 0 : index
    %c0_3 = arith.constant 0 : index
    %1 = vector.load %arg1[%c0_1, %c0_2, %c0_3] : memref<1x8x256xf32, #tpu.memory_space<vmem>>, vector<1x8x256xf32>
    %2 = vector.shape_cast %1 : vector<1x8x256xf32> to vector<8x256xf32>
    %cst = arith.constant dense<0.000000e+00> : vector<32x256xf32>
    %3 = tpu.matmul %0, %2, %cst {dimension_numbers = #tpu.dot_dimension_numbers<[1], [0], [0], [1], [0, 0, 1, 1], [], []>} : vector<32x8xf32>, vector<8x256xf32>, vector<32x256xf32> -> vector<32x256xf32>
    %c0_4 = arith.constant 0 : index
    %c0_5 = arith.constant 0 : index
    %4 = vector.load %arg3[%c0_4, %c0_5] : memref<32x1xf32, #tpu.memory_space<vmem>>, vector<32x1xf32>
    %5 = vector.broadcast %4 : vector<32x1xf32> to vector<32x256xf32>
    %6 = arith.addf %3, %5 : vector<32x256xf32>
    %c0_6 = arith.constant 0 : index
    %c0_7 = arith.constant 0 : index
    %c0_8 = arith.constant 0 : index
    %7 = vector.load %arg4[%c0_6, %c0_7, %c0_8] : memref<1x32x256xf32, #tpu.memory_space<vmem>>, vector<1x32x256xf32>
    %8 = vector.shape_cast %7 : vector<1x32x256xf32> to vector<32x256xf32>
    %9 = vector.shape_cast %6 : vector<32x256xf32> to vector<1x32x256xf32>
    tpu.vector_store %arg4[%c0_6, %c0_7, %c0_8], %9 {strides = array<i32>} : memref<1x32x256xf32, #tpu.memory_space<vmem>>, vector<1x32x256xf32>,
    return
  }
  func.func @transform_0(%arg0: i32) -> (i32, i32, i32) {
    %c0_i32 = arith.constant 0 : i32
    %c0_i32_0 = arith.constant 0 : i32
    %c0_i32_1 = arith.constant 0 : i32
    return %arg0, %c0_i32, %c0_i32_0 : i32, i32, i32
  }
  func.func @transform_1(%arg0: i32) -> (i32, i32) {
    %c0_i32 = arith.constant 0 : i32
    %c0_i32_0 = arith.constant 0 : i32
    %c0_i32_1 = arith.constant 0 : i32
    return %c0_i32, %c0_i32_0 : i32, i32
  }
  func.func @transform_2(%arg0: i32) -> (i32, i32) {
    %c0_i32 = arith.constant 0 : i32
    %c0_i32_0 = arith.constant 0 : i32
    %c0_i32_1 = arith.constant 0 : i32
    return %c0_i32, %c0_i32_0 : i32, i32
  }
  func.func @transform_3(%arg0: i32) -> (i32, i32, i32) {
    %c0_i32 = arith.constant 0 : i32
    %c0_i32_0 = arith.constant 0 : i32
    %c0_i32_1 = arith.constant 0 : i32
    return %arg0, %c0_i32, %c0_i32_0 : i32, i32, i32
  }
}

module attributes {stable_mosaic.version = 11 : i64} {
  func.func @_res_conv_block_kernel(%arg0: i32, %arg1: memref<1x16x1280xf32, #tpu.memory_space<vmem>>, %arg2: memref<1x1280xf32, #tpu.memory_space<vmem>>, %arg3: memref<72x16xf32, #tpu.memory_space<vmem>>, %arg4: memref<8x1xf32, #tpu.memory_space<vmem>>, %arg5: memref<72x8xf32, #tpu.memory_space<vmem>>, %arg6: memref<8x1xf32, #tpu.memory_space<vmem>>, %arg7: memref<8x16xf32, #tpu.memory_space<vmem>>, %arg8: memref<8x1xf32, #tpu.memory_space<vmem>>, %arg9: memref<1x8x1280xf32, #tpu.memory_space<vmem>>) attributes {dimension_semantics = [#tpu.dimension_semantics<parallel>], iteration_bounds = array<i64: 2>, scalar_prefetch = 0 : i64, scratch_operands = 0 : i64, tpu.core_type = #tpu.core_type<tc>, window_params = [{transform_indices = @transform_0, window_bounds = array<i64: 1, 16, 1280>}, {pipeline_mode = #tpu.pipeline_mode<synchronous>, transform_indices = @transform_1, window_bounds = array<i64: 1, 1280>}, {pipeline_mode = #tpu.pipeline_mode<synchronous>, transform_indices = @transform_2, window_bounds = array<i64: 72, 16>}, {pipeline_mode = #tpu.pipeline_mode<synchronous>, transform_indices = @transform_3, window_bounds = array<i64: 8, 1>}, {pipeline_mode = #tpu.pipeline_mode<synchronous>, transform_indices = @transform_4, window_bounds = array<i64: 72, 8>}, {pipeline_mode = #tpu.pipeline_mode<synchronous>, transform_indices = @transform_5, window_bounds = array<i64: 8, 1>}, {pipeline_mode = #tpu.pipeline_mode<synchronous>, transform_indices = @transform_6, window_bounds = array<i64: 8, 16>}, {pipeline_mode = #tpu.pipeline_mode<synchronous>, transform_indices = @transform_7, window_bounds = array<i64: 8, 1>}, {transform_indices = @transform_8, window_bounds = array<i64: 1, 8, 1280>}]} {
    %c0 = arith.constant 0 : index
    %c0_0 = arith.constant 0 : index
    %c0_1 = arith.constant 0 : index
    %0 = vector.load %arg1[%c0, %c0_0, %c0_1] : memref<1x16x1280xf32, #tpu.memory_space<vmem>>, vector<1x16x1280xf32>
    %1 = vector.shape_cast %0 : vector<1x16x1280xf32> to vector<16x1280xf32>
    %cst = arith.constant 0.000000e+00 : f32
    %2 = vector.broadcast %cst : f32 to vector<16x1280xf32>
    %3 = arith.maximumf %1, %2 : vector<16x1280xf32>
    %c0_2 = arith.constant 0 : index
    %c0_3 = arith.constant 0 : index
    %4 = vector.load %arg2[%c0_2, %c0_3] : memref<1x1280xf32, #tpu.memory_space<vmem>>, vector<1x1280xf32>
    %c0_4 = arith.constant 0 : index
    %c0_5 = arith.constant 0 : index
    %5 = vector.load %arg3[%c0_4, %c0_5] : memref<72x16xf32, #tpu.memory_space<vmem>>, vector<72x16xf32>
    %cst_6 = arith.constant dense<0.000000e+00> : vector<72x1280xf32>
    %6 = tpu.matmul %5, %3, %cst_6 {dimension_numbers = #tpu.dot_dimension_numbers<[1], [0], [0], [1], [0, 0, 1, 1], [], []>} : vector<72x16xf32>, vector<16x1280xf32>, vector<72x1280xf32> -> vector<72x1280xf32>
    %7 = vector.extract_strided_slice %6 {offsets = [0, 0], sizes = [8, 1280], strides = [1, 1]} : vector<72x1280xf32> to vector<8x1280xf32>
    %c35_i32 = arith.constant 35 : i32
    %8 = tpu.dynamic_rotate %7 by %c35_i32 dim 1 : vector<8x1280xf32>, i32 -> vector<8x1280xf32>
    %9 = vector.extract_strided_slice %6 {offsets = [8, 0], sizes = [8, 1280], strides = [1, 1]} : vector<72x1280xf32> to vector<8x1280xf32>
    %c34_i32 = arith.constant 34 : i32
    %10 = tpu.dynamic_rotate %9 by %c34_i32 dim 1 : vector<8x1280xf32>, i32 -> vector<8x1280xf32>
    %11 = arith.addf %8, %10 : vector<8x1280xf32>
    %12 = vector.extract_strided_slice %6 {offsets = [16, 0], sizes = [8, 1280], strides = [1, 1]} : vector<72x1280xf32> to vector<8x1280xf32>
    %c33_i32 = arith.constant 33 : i32
    %13 = tpu.dynamic_rotate %12 by %c33_i32 dim 1 : vector<8x1280xf32>, i32 -> vector<8x1280xf32>
    %14 = arith.addf %11, %13 : vector<8x1280xf32>
    %15 = vector.extract_strided_slice %6 {offsets = [24, 0], sizes = [8, 1280], strides = [1, 1]} : vector<72x1280xf32> to vector<8x1280xf32>
    %c1_i32 = arith.constant 1 : i32
    %16 = tpu.dynamic_rotate %15 by %c1_i32 dim 1 : vector<8x1280xf32>, i32 -> vector<8x1280xf32>
    %17 = arith.addf %14, %16 : vector<8x1280xf32>
    %18 = vector.extract_strided_slice %6 {offsets = [32, 0], sizes = [8, 1280], strides = [1, 1]} : vector<72x1280xf32> to vector<8x1280xf32>
    %19 = arith.addf %17, %18 : vector<8x1280xf32>
    %20 = vector.extract_strided_slice %6 {offsets = [40, 0], sizes = [8, 1280], strides = [1, 1]} : vector<72x1280xf32> to vector<8x1280xf32>
    %c1279_i32 = arith.constant 1279 : i32
    %21 = tpu.dynamic_rotate %20 by %c1279_i32 dim 1 : vector<8x1280xf32>, i32 -> vector<8x1280xf32>
    %22 = arith.addf %19, %21 : vector<8x1280xf32>
    %23 = vector.extract_strided_slice %6 {offsets = [48, 0], sizes = [8, 1280], strides = [1, 1]} : vector<72x1280xf32> to vector<8x1280xf32>
    %c1247_i32 = arith.constant 1247 : i32
    %24 = tpu.dynamic_rotate %23 by %c1247_i32 dim 1 : vector<8x1280xf32>, i32 -> vector<8x1280xf32>
    %25 = arith.addf %22, %24 : vector<8x1280xf32>
    %26 = vector.extract_strided_slice %6 {offsets = [56, 0], sizes = [8, 1280], strides = [1, 1]} : vector<72x1280xf32> to vector<8x1280xf32>
    %c1246_i32 = arith.constant 1246 : i32
    %27 = tpu.dynamic_rotate %26 by %c1246_i32 dim 1 : vector<8x1280xf32>, i32 -> vector<8x1280xf32>
    %28 = arith.addf %25, %27 : vector<8x1280xf32>
    %29 = vector.extract_strided_slice %6 {offsets = [64, 0], sizes = [8, 1280], strides = [1, 1]} : vector<72x1280xf32> to vector<8x1280xf32>
    %c1245_i32 = arith.constant 1245 : i32
    %30 = tpu.dynamic_rotate %29 by %c1245_i32 dim 1 : vector<8x1280xf32>, i32 -> vector<8x1280xf32>
    %31 = arith.addf %28, %30 : vector<8x1280xf32>
    %c0_7 = arith.constant 0 : index
    %c0_8 = arith.constant 0 : index
    %32 = vector.load %arg4[%c0_7, %c0_8] : memref<8x1xf32, #tpu.memory_space<vmem>>, vector<8x1xf32>
    %33 = vector.broadcast %32 : vector<8x1xf32> to vector<8x1280xf32>
    %34 = arith.addf %31, %33 : vector<8x1280xf32>
    %cst_9 = arith.constant 0.000000e+00 : f32
    %35 = vector.broadcast %cst_9 : f32 to vector<8x1280xf32>
    %36 = arith.maximumf %34, %35 : vector<8x1280xf32>
    %37 = vector.broadcast %4 : vector<1x1280xf32> to vector<8x1280xf32>
    %38 = arith.mulf %36, %37 : vector<8x1280xf32>
    %c0_10 = arith.constant 0 : index
    %c0_11 = arith.constant 0 : index
    %39 = vector.load %arg5[%c0_10, %c0_11] : memref<72x8xf32, #tpu.memory_space<vmem>>, vector<72x8xf32>
    %cst_12 = arith.constant dense<0.000000e+00> : vector<72x1280xf32>
    %40 = tpu.matmul %39, %38, %cst_12 {dimension_numbers = #tpu.dot_dimension_numbers<[1], [0], [0], [1], [0, 0, 1, 1], [], []>} : vector<72x8xf32>, vector<8x1280xf32>, vector<72x1280xf32> -> vector<72x1280xf32>
    %41 = vector.extract_strided_slice %40 {offsets = [0, 0], sizes = [8, 1280], strides = [1, 1]} : vector<72x1280xf32> to vector<8x1280xf32>
    %c35_i32_13 = arith.constant 35 : i32
    %42 = tpu.dynamic_rotate %41 by %c35_i32_13 dim 1 : vector<8x1280xf32>, i32 -> vector<8x1280xf32>
    %43 = vector.extract_strided_slice %40 {offsets = [8, 0], sizes = [8, 1280], strides = [1, 1]} : vector<72x1280xf32> to vector<8x1280xf32>
    %c34_i32_14 = arith.constant 34 : i32
    %44 = tpu.dynamic_rotate %43 by %c34_i32_14 dim 1 : vector<8x1280xf32>, i32 -> vector<8x1280xf32>
    %45 = arith.addf %42, %44 : vector<8x1280xf32>
    %46 = vector.extract_strided_slice %40 {offsets = [16, 0], sizes = [8, 1280], strides = [1, 1]} : vector<72x1280xf32> to vector<8x1280xf32>
    %c33_i32_15 = arith.constant 33 : i32
    %47 = tpu.dynamic_rotate %46 by %c33_i32_15 dim 1 : vector<8x1280xf32>, i32 -> vector<8x1280xf32>
    %48 = arith.addf %45, %47 : vector<8x1280xf32>
    %49 = vector.extract_strided_slice %40 {offsets = [24, 0], sizes = [8, 1280], strides = [1, 1]} : vector<72x1280xf32> to vector<8x1280xf32>
    %c1_i32_16 = arith.constant 1 : i32
    %50 = tpu.dynamic_rotate %49 by %c1_i32_16 dim 1 : vector<8x1280xf32>, i32 -> vector<8x1280xf32>
    %51 = arith.addf %48, %50 : vector<8x1280xf32>
    %52 = vector.extract_strided_slice %40 {offsets = [32, 0], sizes = [8, 1280], strides = [1, 1]} : vector<72x1280xf32> to vector<8x1280xf32>
    %53 = arith.addf %51, %52 : vector<8x1280xf32>
    %54 = vector.extract_strided_slice %40 {offsets = [40, 0], sizes = [8, 1280], strides = [1, 1]} : vector<72x1280xf32> to vector<8x1280xf32>
    %c1279_i32_17 = arith.constant 1279 : i32
    %55 = tpu.dynamic_rotate %54 by %c1279_i32_17 dim 1 : vector<8x1280xf32>, i32 -> vector<8x1280xf32>
    %56 = arith.addf %53, %55 : vector<8x1280xf32>
    %57 = vector.extract_strided_slice %40 {offsets = [48, 0], sizes = [8, 1280], strides = [1, 1]} : vector<72x1280xf32> to vector<8x1280xf32>
    %c1247_i32_18 = arith.constant 1247 : i32
    %58 = tpu.dynamic_rotate %57 by %c1247_i32_18 dim 1 : vector<8x1280xf32>, i32 -> vector<8x1280xf32>
    %59 = arith.addf %56, %58 : vector<8x1280xf32>
    %60 = vector.extract_strided_slice %40 {offsets = [56, 0], sizes = [8, 1280], strides = [1, 1]} : vector<72x1280xf32> to vector<8x1280xf32>
    %c1246_i32_19 = arith.constant 1246 : i32
    %61 = tpu.dynamic_rotate %60 by %c1246_i32_19 dim 1 : vector<8x1280xf32>, i32 -> vector<8x1280xf32>
    %62 = arith.addf %59, %61 : vector<8x1280xf32>
    %63 = vector.extract_strided_slice %40 {offsets = [64, 0], sizes = [8, 1280], strides = [1, 1]} : vector<72x1280xf32> to vector<8x1280xf32>
    %c1245_i32_20 = arith.constant 1245 : i32
    %64 = tpu.dynamic_rotate %63 by %c1245_i32_20 dim 1 : vector<8x1280xf32>, i32 -> vector<8x1280xf32>
    %65 = arith.addf %62, %64 : vector<8x1280xf32>
    %c0_21 = arith.constant 0 : index
    %c0_22 = arith.constant 0 : index
    %66 = vector.load %arg6[%c0_21, %c0_22] : memref<8x1xf32, #tpu.memory_space<vmem>>, vector<8x1xf32>
    %67 = vector.broadcast %66 : vector<8x1xf32> to vector<8x1280xf32>
    %68 = arith.addf %65, %67 : vector<8x1280xf32>
    %c0_23 = arith.constant 0 : index
    %c0_24 = arith.constant 0 : index
    %69 = vector.load %arg7[%c0_23, %c0_24] : memref<8x16xf32, #tpu.memory_space<vmem>>, vector<8x16xf32>
    %cst_25 = arith.constant dense<0.000000e+00> : vector<8x1280xf32>
    %70 = tpu.matmul %69, %1, %cst_25 {dimension_numbers = #tpu.dot_dimension_numbers<[1], [0], [0], [1], [0, 0, 1, 1], [], []>} : vector<8x16xf32>, vector<16x1280xf32>, vector<8x1280xf32> -> vector<8x1280xf32>
    %71 = arith.addf %68, %70 : vector<8x1280xf32>
    %c0_26 = arith.constant 0 : index
    %c0_27 = arith.constant 0 : index
    %72 = vector.load %arg8[%c0_26, %c0_27] : memref<8x1xf32, #tpu.memory_space<vmem>>, vector<8x1xf32>
    %73 = vector.broadcast %72 : vector<8x1xf32> to vector<8x1280xf32>
    %74 = arith.addf %71, %73 : vector<8x1280xf32>
    %c0_28 = arith.constant 0 : index
    %c0_29 = arith.constant 0 : index
    %c0_30 = arith.constant 0 : index
    %75 = vector.load %arg9[%c0_28, %c0_29, %c0_30] : memref<1x8x1280xf32, #tpu.memory_space<vmem>>, vector<1x8x1280xf32>
    %76 = vector.shape_cast %75 : vector<1x8x1280xf32> to vector<8x1280xf32>
    %77 = vector.shape_cast %74 : vector<8x1280xf32> to vector<1x8x1280xf32>
    tpu.vector_store %arg9[%c0_28, %c0_29, %c0_30], %77 {strides = array<i32>} : memref<1x8x1280xf32, #tpu.memory_space<vmem>>, vector<1x8x1280xf32>,
    return
  }
  func.func @transform_0(%arg0: i32) -> (i32, i32, i32) {
    %c0_i32 = arith.constant 0 : i32
    %c0_i32_0 = arith.constant 0 : i32
    %c0_i32_1 = arith.constant 0 : i32
    return %arg0, %c0_i32, %c0_i32_0 : i32, i32, i32
  }
  func.func @transform_1(%arg0: i32) -> (i32, i32) {
    %c0_i32 = arith.constant 0 : i32
    %c0_i32_0 = arith.constant 0 : i32
    %c0_i32_1 = arith.constant 0 : i32
    return %c0_i32, %c0_i32_0 : i32, i32
  }
  func.func @transform_2(%arg0: i32) -> (i32, i32) {
    %c0_i32 = arith.constant 0 : i32
    %c0_i32_0 = arith.constant 0 : i32
    %c0_i32_1 = arith.constant 0 : i32
    return %c0_i32, %c0_i32_0 : i32, i32
  }
  func.func @transform_3(%arg0: i32) -> (i32, i32) {
    %c0_i32 = arith.constant 0 : i32
    %c0_i32_0 = arith.constant 0 : i32
    %c0_i32_1 = arith.constant 0 : i32
    return %c0_i32, %c0_i32_0 : i32, i32
  }
  func.func @transform_4(%arg0: i32) -> (i32, i32) {
    %c0_i32 = arith.constant 0 : i32
    %c0_i32_0 = arith.constant 0 : i32
    %c0_i32_1 = arith.constant 0 : i32
    return %c0_i32, %c0_i32_0 : i32, i32
  }
  func.func @transform_5(%arg0: i32) -> (i32, i32) {
    %c0_i32 = arith.constant 0 : i32
    %c0_i32_0 = arith.constant 0 : i32
    %c0_i32_1 = arith.constant 0 : i32
    return %c0_i32, %c0_i32_0 : i32, i32
  }
  func.func @transform_6(%arg0: i32) -> (i32, i32) {
    %c0_i32 = arith.constant 0 : i32
    %c0_i32_0 = arith.constant 0 : i32
    %c0_i32_1 = arith.constant 0 : i32
    return %c0_i32, %c0_i32_0 : i32, i32
  }
  func.func @transform_7(%arg0: i32) -> (i32, i32) {
    %c0_i32 = arith.constant 0 : i32
    %c0_i32_0 = arith.constant 0 : i32
    %c0_i32_1 = arith.constant 0 : i32
    return %c0_i32, %c0_i32_0 : i32, i32
  }
  func.func @transform_8(%arg0: i32) -> (i32, i32, i32) {
    %c0_i32 = arith.constant 0 : i32
    %c0_i32_0 = arith.constant 0 : i32
    %c0_i32_1 = arith.constant 0 : i32
    return %arg0, %c0_i32, %c0_i32_0 : i32, i32, i32
  }
}

</mosaic_0001>

<bundles_post_ra>
// kernel: tile.0
= control target key start
LH: loop header
LB: loop body
LE: loop exit
PB: predicated region body
PF: predicated region fallthrough
CT: control target
= control target key end

     0   :  { %s66_s8 = smov 125   ;;  %vm7_vm0 = vcmask 7168   ;;  %s67_s11 = smov 126   ;;  %s117_s0 = inlined_call_operand.vmem [shape: f32[4,8], index: 0, kind: input, shape index: {}]   ;;  %s118_s1 = inlined_call_operand.vmem [shape: f32[32,1], index: 1, kind: output, shape index: {}]  }
   0x1   :  { %v4_v0 = vld [vmem:[%s117_s0] sm:$0xf]  ;;  %s65_s0 = smov 127   ;;  %s68_s12 = smov 124  }
   0x2   :  { %5 = vst [vmem:[#allocation0] sm:$0xf] %v4_v0  ;;  %s69_s13 = smov 123   ;;  %s70_s14 = smov 122  }
   0x3   :  { %s71_s15 = smov 121  }
   0x9   :  { %v9_v1 = vld [vmem:[#allocation0] sm:$0xf]  }
   0xa   :  { %v21_v2 = vld [vmem:[#allocation0] sm:$0xf]   ;;  %10 = vrot.lane.b32.xlu0 %v9_v1, %s65_s0 }
   0xb   :  { %22 = vrot.lane.b32.xlu1 %v21_v2, %s66_s8  ;;  %v15_v3 = vld [vmem:[#allocation0] sm:$0xf]  }
   0xc   :  { %v27_v4 = vld [vmem:[#allocation0] sm:$0xf]  }
   0xd   :  { %v6_v5 = vld [vmem:[#allocation0] sm:$0xf]  }
   0xe   :  { %8 = vst.msk [vmem:[%s118_s1] ss:$8 sm:$0xf] %vm7_vm0, %v6_v5   ;;  %16 = vrot.lane.b32.xlu0 %v15_v3, %s67_s11  ;;  %v33_v6 = vld [vmem:[#allocation0] sm:$0xf]  }
   0xf   :  { %28 = vrot.lane.b32.xlu1 %v27_v4, %s68_s12  ;;  %v39_v7 = vld [vmem:[#allocation0] sm:$0xf]  }
  0x10   :  { %v45_v8 = vld [vmem:[#allocation0] sm:$0xf]  }
  0x12   :  { %34 = vrot.lane.b32.xlu0 %v33_v6, %s69_s13 }
  0x13   :  { %40 = vrot.lane.b32.xlu1 %v39_v7, %s70_s14 }
  0x16   :  { %46 = vrot.lane.b32.xlu0 %v45_v8, %s71_s15 }
  0x7c   :  { %v11_v9 = vpop.permute.xlu0 %10  }
  0x7d   :  { %v23_v10 = vpop.permute.xlu1 %22   ;;  %51 = vst.msk [vmem:[%s118_s1 + $0x1] ss:$8 sm:$0xf] %vm7_vm0, %v11_v9  }
  0x7e   :  { %53 = vst.msk [vmem:[%s118_s1 + $0x3] ss:$8 sm:$0xf] %vm7_vm0, %v23_v10  }
  0x80   :  { %v17_v11 = vpop.permute.xlu0 %16  }
  0x81   :  { %v29_v12 = vpop.permute.xlu1 %28   ;;  %52 = vst.msk [vmem:[%s118_s1 + $0x2] ss:$8 sm:$0xf] %vm7_vm0, %v17_v11  }
  0x82   :  { %54 = vst.msk [vmem:[%s118_s1 + $0x4] ss:$8 sm:$0xf] %vm7_vm0, %v29_v12  }
  0x84   :  { %v35_v13 = vpop.permute.xlu0 %34  }
  0x85   :  { %v41_v14 = vpop.permute.xlu1 %40   ;;  %55 = vst.msk [vmem:[%s118_s1 + $0x5] ss:$8 sm:$0xf] %vm7_vm0, %v35_v13  }
  0x86   :  { %56 = vst.msk [vmem:[%s118_s1 + $0x6] ss:$8 sm:$0xf] %vm7_vm0, %v41_v14  }
  0x88   :  { %v47_v15 = vpop.permute.xlu0 %46  }
  0x89   :  { %57 = vst.msk [vmem:[%s118_s1 + $0x7] ss:$8 sm:$0xf] %vm7_vm0, %v47_v15  }

// kernel: tile.8
= control target key start
LH: loop header
LB: loop body
LE: loop exit
PB: predicated region body
PF: predicated region fallthrough
CT: control target
= control target key end

     0   :  { %s22_s0 = inlined_call_operand.vmem [shape: f32[8], index: 0, kind: input, shape index: {}]   ;;  %s23_s1 = inlined_call_operand.vmem [shape: f32[4,8], index: 1, kind: output, shape index: {}]  }
   0x1   :  { %v4_v0 = vld [vmem:[%s22_s0] ss:$0 sm:$0xff] }
   0x2   :  { %5 = vst [vmem:[%s23_s1] sm:$0xf] %v4_v0 }

// kernel: res_up_block.2
= control target key start
LH: loop header
LB: loop body
LE: loop exit
PB: predicated region body
PF: predicated region fallthrough
CT: control target
= control target key end

     0   :  { %s427_s12 = smov 0   ;;  %s476_s0 = inlined_call_operand.vmem [shape: f32[2,8,256], index: 0, kind: input, shape index: {}]   ;;  %s477_s1 = inlined_call_operand.vmem [shape: f32[32,8], index: 1, kind: input, shape index: {}]   ;;  %s478_s2 = inlined_call_operand.vmem [shape: f32[32,1], index: 2, kind: input, shape index: {}]   ;;  %s479_s3 = inlined_call_operand.vmem [shape: f32[2,32,256], index: 3, kind: output, shape index: {}]  }
   0x1 LB: > { %s366_s13 = sadd.s32 4294967295, %s403_s12   ;;  %p370_p0 = scmp.ge.s32.totalorder %s403_s12, 1  ;;  %s403_s12 = sphi %s427_s12, %s13_s12  }
   0x2   : > { %p137_p1 = scmp.lt.s32.totalorder %s403_s12, 3 }
   0x4   : > { %p138_p2 = pnand %p370_p0, %p137_p1 }
   0x5   : > { %p161_p3 = scmp.lt.s32.totalorder (!%p138_p2), %s366_s13, 1  ;;  %v405_v0 = vmov (!%p138_p2), 0.0   ;;  %v179_v1 = vld [vmem:[%s478_s2 + $0x10] sm:$0xff] (!%p138_p2)  ;;  %v177_v2 = vld [vmem:[%s478_s2] sm:$0xff] (!%p138_p2)  ;;  %v406_v3 = vmov (!%p138_p2), 0   ;;  %vm201_vm0 = vcmask (!%p138_p2), 64512  }
   0x6   : > { %141 = sbr.rel (%p138_p2) target bundleno = 239 (0xef), region = 32  ;;  %278 = vmatprep.mubr.f32.mxu0 (!%p138_p2), %v405_v0  ;;  %290 = vmatprep.mubr.f32.mxu1 (!%p138_p2), %v405_v0  ;;  %v171_v4 = vld [vmem:[%s477_s1] sm:$0xff] (!%p138_p2)  ;;  %v173_v7 = vld [vmem:[%s477_s1 + $0x10] sm:$0xff] (!%p138_p2)  ;;  %v180_v8 = vld [vmem:[%s478_s2 + $0x18] sm:$0xff] (!%p138_p2) }
   0x7   : > { %396 = vset.pattern.permute.xlu1 (!%p138_p2), %v406_v3  ;;  %395 = vset.pattern.permute.xlu0 (!%p138_p2), %v406_v3  ;;  %v178_v9 = vld [vmem:[%s478_s2 + $0x8] sm:$0xff] (!%p138_p2)  ;;  %v174_v11 = vld [vmem:[%s477_s1 + $0x18] sm:$0xff] (!%p138_p2) }
   0x8   : > { %193 = vperm.xlu1 (!%p138_p2), %396, %v179_v1   ;;  %183 = vperm.xlu0 (!%p138_p2), %395, %v177_v2   ;;  %v172_v10 = vld [vmem:[%s477_s1 + $0x8] sm:$0xff] (!%p138_p2) }
   0xc   : > { %198 = vperm.xlu1 (!%p138_p2), %396, %v180_v8   ;;  %188 = vperm.xlu0 (!%p138_p2), %395, %v178_v9  }
   0xd   : > { %s481_s13 = smov (!%p161_p3, %s366_s13), 1 }
   0xe   : > { %s381_s18 = sshll.u32 %s481_s13, 4  ;;  %s382_s7 = sshll.u32 %s481_s13, 6 }
   0xf   : > { %s165_s21 = scalar_lea.vmem %s476_s0, %s381_s18  ;;  %s170_s10 = scalar_lea.vmem %s479_s3, %s382_s7 }
  0x10   : > { %v176_v5 = vld [vmem:[%s165_s21 + $0x8] sm:$0xff]  ;;  %v175_v6 = vld [vmem:[%s165_s21] sm:$0xff] }
  0x11   : > { %214 = vmatprep.subr.mxu0 %v176_v5  ;;  %383 = vmatprep.subr.mxu1 %v176_v5 }
  0x12   : > { %215 = vmatpush1.msra.mxu0 %v175_v6  ;;  %384 = vmatpush1.msra.mxu1 %v175_v6 }
  0x13   : > { %375 = vmatmul.mubr.msk.f32.vlgmr.msra.gmra.mrb[0].mxu0 %vm201_vm0, %v171_v4  ;;  %377 = vmatmul.mubr.msk.f32.vlgmr.msra.gmra.mrb[0].mxu1 %vm201_vm0, %v173_v7 }
  0x14   : > { %284 = vmatprep.mubr.f32.mxu0 %v405_v0  ;;  %296 = vmatprep.mubr.f32.mxu1 %v405_v0 }
  0x17   : > { %376 = vmatmul.mubr.msk.f32.gmra.mrb[2].mxu0 %vm201_vm0, %v172_v10  ;;  %378 = vmatmul.mubr.msk.f32.gmra.mrb[2].mxu1 %vm201_vm0, %v174_v11 }
  0x87   : > { %v194_v12 = vpop.permute.xlu1 %193  ;;  %v184_v13 = vpop.permute.xlu0 %183 }
  0x8b   : > { %v199_v22 = vpop.permute.xlu1 %198  ;;  %v189_v23 = vpop.permute.xlu0 %188 }
  0xe6   : > { %v280_v14 = vpop.f32.mrb[0].mxu0  ;;  %v292_v15 = vpop.f32.mrb[0].mxu1 }
  0xe7   : > { %v281_v16 = vadd.f32 %v280_v14, %v184_v13  ;;  %v293_v17 = vadd.f32 %v292_v15, %v194_v12  ;;  %v282_v18 = vpop.f32.mrb[1].mxu0  ;;  %v294_v19 = vpop.f32.mrb[1].mxu1 }
  0xe8   : > { %v283_v20 = vadd.f32 %v282_v18, %v184_v13  ;;  %v295_v21 = vadd.f32 %v294_v19, %v194_v12 }
  0xe9   : > { %303 = vst [vmem:[%s170_s10] sm:$0xff] %v281_v16  ;;  %307 = vst [vmem:[%s170_s10 + $0x20] sm:$0xff] %v293_v17 }
  0xea   : > { %304 = vst [vmem:[%s170_s10 + $0x8] sm:$0xff] %v283_v20  ;;  %308 = vst [vmem:[%s170_s10 + $0x28] sm:$0xff] %v295_v21  ;;  %v286_v24 = vpop.f32.mrb[2].mxu0  ;;  %v298_v25 = vpop.f32.mrb[2].mxu1 }
  0xeb   : > { %v287_v26 = vadd.f32 %v286_v24, %v189_v23  ;;  %v299_v27 = vadd.f32 %v298_v25, %v199_v22  ;;  %v288_v28 = vpop.f32.mrb[3].mxu0  ;;  %v300_v29 = vpop.f32.mrb[3].mxu1 }
  0xec   : > { %v289_v30 = vadd.f32 %v288_v28, %v189_v23  ;;  %v301_v31 = vadd.f32 %v300_v29, %v199_v22 }
  0xed   : > { %305 = vst [vmem:[%s170_s10 + $0x10] sm:$0xff] %v287_v26  ;;  %309 = vst [vmem:[%s170_s10 + $0x30] sm:$0xff] %v299_v27 }
  0xee   : > { %306 = vst [vmem:[%s170_s10 + $0x18] sm:$0xff] %v289_v30  ;;  %310 = vst [vmem:[%s170_s10 + $0x38] sm:$0xff] %v301_v31 }
  0xef PF: > { %s13_s12 = sadd.s32 1, %s403_s12  }
  0xf0   : > { %p10_p4 = scmp.ge.s32.totalorder %s13_s12, 4  }
  0xf2   :  { %12 = sbr.rel (!%p10_p4) target bundleno = 1 (0x1), region = 62 }

// kernel: res_up_block.3
= control target key start
LH: loop header
LB: loop body
LE: loop exit
PB: predicated region body
PF: predicated region fallthrough
CT: control target
= control target key end

     0   :  { %s3131_s27 = smov 0   ;;  %s4781_s0 = inlined_call_operand.vmem [shape: f32[2,16,1280], index: 0, kind: input, shape index: {}]   ;;  %s4782_s1 = inlined_call_operand.vmem [shape: f32[1,1280], index: 1, kind: input, shape index: {}]   ;;  %s4783_s2 = inlined_call_operand.vmem [shape: f32[72,16], index: 2, kind: input, shape index: {}]   ;;  %s4784_s3 = inlined_call_operand.vmem [shape: f32[8,1], index: 3, kind: input, shape index: {}]   ;;  %s4785_s4 = inlined_call_operand.vmem [shape: f32[72,8], index: 4, kind: input, shape index: {}]   ;;  %s4786_s5 = inlined_call_operand.vmem [shape: f32[8,1], index: 5, kind: input, shape index: {}]   ;;  %s4787_s6 = inlined_call_operand.vmem [shape: f32[8,16], index: 6, kind: input, shape index: {}]   ;;  %s4788_s7 = inlined_call_operand.vmem [shape: f32[8,1], index: 7, kind: input, shape index: {}]   ;;  %s4789_s8 = inlined_call_operand.vmem [shape: f32[2,8,1280], index: 8, kind: output, shape index: {}]  }
   0x1 LB: > { %s2816_s28 = sadd.s32 4294967295, %s3074_s27   ;;  %p2820_p0 = scmp.ge.s32.totalorder %s3074_s27, 1  ;;  %s3074_s27 = sphi %s3131_s27, %s18_s27  }
   0x2   : > { %p262_p1 = scmp.lt.s32.totalorder %s3074_s27, 3 }
   0x4   : > { %p263_p2 = pnand %p2820_p0, %p262_p1 }
   0x6   : > { %266 = sbr.rel (%p263_p2) target bundleno = 999 (0x3e7), region = 52 }
   0xd   : > { %p296_p3 = scmp.lt.s32.totalorder %s2816_s28, 1  ;;  %v4791_v0 = vmov 0.0   ;;  %v3077_v1 = vmov 0   ;;  %v1310_v2 = vld [vmem:[%s4784_s3] sm:$0xff]  ;;  %vm357_vm0 = vcmask 130048   ;;  %v3199_v50 = vld [vmem:[%s4783_s2 + $0x8] sm:$0xff] }
   0xe   : > { %449 = vmatprep.mubr.f32.mxu0 %v4791_v0  ;;  %568 = vmatprep.mubr.f32.mxu1 %v4791_v0  ;;  %v3187_v38 = vld [vmem:[%s4783_s2] sm:$0xff]  ;;  %v3208_v52 = vld [vmem:[%s4783_s2 + $0x10] sm:$0xff]  ;;  %v3219_v53 = vld [vmem:[%s4783_s2 + $0x18] sm:$0xff]  ;;  %s3078_s11 = smov 35   ;;  %s3079_s13 = smov 34   ;;  %vm1407_vm9 = vcmask 64512  }
   0xf   : > { %s4809_s28 = smov (!%p296_p3, %s2816_s28), 1  ;;  %3050 = vset.pattern.permute.xlu1 %v3077_v1  ;;  %3051 = vset.pattern.permute.xlu0 %v3077_v1  ;;  %v3230_v54 = vld [vmem:[%s4783_s2 + $0x20] sm:$0xff]  ;;  %v3241_v55 = vld [vmem:[%s4783_s2 + $0x28] sm:$0xff]  ;;  %v3252_v56 = vld [vmem:[%s4783_s2 + $0x30] sm:$0xff]  ;;  %s3080_s14 = smov 33  }
  0x10   : > { %s3030_s9 = smul.u32 160, %s4809_s28  ;;  %1313 = vperm.xlu1 %3050, %v1310_v2   ;;  %v3263_v57 = vld [vmem:[%s4783_s2 + $0x38] sm:$0xff]  ;;  %v3276_v60 = vld [vmem:[%s4783_s2 + $0x40] sm:$0xff]  ;;  %s3081_s15 = smov 1  }
  0x11   : > { %s3082_s16 = smov 127   ;;  %s3083_s17 = smov 95  }
  0x12   : > { %s3150_s12 = scalar_lea.vmem %s4781_s0, %s3030_s9  ;;  %s3084_s18 = smov 94  }
  0x13   : > { %v307_v3 = vld [vmem:[%s3150_s12 + $0x8] sm:$0xff]  ;;  %v317_v4 = vld [vmem:[%s3150_s12 + $0x58] sm:$0xff]  ;;  %v3157_v10 = vld [vmem:[%s3150_s12] sm:$0xff]  ;;  %s3085_s19 = smov 93  }
  0x14   : > { %v309_v5 = vld [vmem:[%s3150_s12 + $0x18] sm:$0xff]  ;;  %v327_v6 = vmax.f32 %v307_v3, 0.0  ;;  %v337_v7 = vmax.f32 %v317_v4, 0.0  ;;  %v319_v8 = vld [vmem:[%s3150_s12 + $0x68] sm:$0xff]  ;;  %4794 = vst [vmem:[#allocation2_spill] sm:$0xff] %v3157_v10  ;;  %v3160_v11 = vld [vmem:[%s3150_s12 + $0x50] sm:$0xff] }
  0x15   : > { %v329_v9 = vmax.f32 %v309_v5, 0.0  ;;  %v339_v12 = vmax.f32 %v319_v8, 0.0  ;;  %v326_v13 = vmax.f32 %v3157_v10, 0.0  ;;  %v336_v14 = vmax.f32 %v3160_v11, 0.0  ;;  %v3167_v16 = vld [vmem:[%s3150_s12 + $0x10] sm:$0xff]  ;;  %v3170_v17 = vld [vmem:[%s3150_s12 + $0x60] sm:$0xff] }
  0x16   : > { %v311_v18 = vld [vmem:[%s3150_s12 + $0x28] sm:$0xff]  ;;  %v2920_v19 = vpack.c.bf16 %v337_v7, %v327_v6  ;;  %v328_v20 = vmax.f32 %v3167_v16, 0.0  ;;  %v338_v21 = vmax.f32 %v3170_v17, 0.0  ;;  %v321_v23 = vld [vmem:[%s3150_s12 + $0x78] sm:$0xff]  ;;  %v310_v24 = vld [vmem:[%s3150_s12 + $0x20] sm:$0xff] }
  0x17   : > { %v320_v25 = vld [vmem:[%s3150_s12 + $0x70] sm:$0xff]  ;;  %v2924_v26 = vpack.c.bf16 %v339_v12, %v329_v9  ;;  %v2922_v27 = vpack.c.bf16 %v336_v14, %v326_v13  ;;  %v331_v28 = vmax.f32 %v311_v18, 0.0  ;;  %v341_v29 = vmax.f32 %v321_v23, 0.0  ;;  %v315_v30 = vld [vmem:[%s3150_s12 + $0x48] sm:$0xff]  ;;  %v325_v31 = vld [vmem:[%s3150_s12 + $0x98] sm:$0xff] }
  0x18   : > { %v313_v32 = vld [vmem:[%s3150_s12 + $0x38] sm:$0xff]  ;;  %2921 = vmatprep.subr.bf16.mxu0 %v2920_v19  ;;  %v2926_v33 = vpack.c.bf16 %v338_v21, %v328_v20  ;;  %v330_v34 = vmax.f32 %v310_v24, 0.0  ;;  %v340_v35 = vmax.f32 %v320_v25, 0.0  ;;  %v335_v36 = vmax.f32 %v315_v30, 0.0  ;;  %v323_v37 = vld [vmem:[%s3150_s12 + $0x88] sm:$0xff]  ;;  %v312_v43 = vld [vmem:[%s3150_s12 + $0x30] sm:$0xff] }
  0x19   : > { %2925 = vmatprep.subr.bf16.mxu1 %v2924_v26  ;;  %2923 = vmatpush1.bf16.msra.mxu0 %v2922_v27  ;;  %v2928_v39 = vpack.c.bf16 %v341_v29, %v331_v28  ;;  %v345_v40 = vmax.f32 %v325_v31, 0.0  ;;  %v333_v41 = vmax.f32 %v313_v32, 0.0  ;;  %v343_v42 = vmax.f32 %v323_v37, 0.0  ;;  %v322_v44 = vld [vmem:[%s3150_s12 + $0x80] sm:$0xff]  ;;  %v324_v59 = vld [vmem:[%s3150_s12 + $0x90] sm:$0xff] }
  0x1a   : > { %2927 = vmatpush1.bf16.msra.mxu1 %v2926_v33  ;;  %v2930_v45 = vpack.c.bf16 %v340_v35, %v330_v34  ;;  %v332_v46 = vmax.f32 %v312_v43, 0.0  ;;  %v342_v49 = vmax.f32 %v322_v44, 0.0  ;;  %v314_v58 = vld [vmem:[%s3150_s12 + $0x40] sm:$0xff]  ;;  %v344_v62 = vmax.f32 %v324_v59, 0.0 }
  0x1b   : > { %2929 = vmatprep.subr.bf16.mxu0 %v2928_v39  ;;  %v2936_v47 = vpack.c.bf16 %v345_v40, %v335_v36  ;;  %v2932_v48 = vpack.c.bf16 %v343_v42, %v333_v41  ;;  %v334_v61 = vmax.f32 %v314_v58, 0.0 }
  0x1c   : > { %2823 = vmatmul.mubr.msk.f32.vlgmr.msra.gmra.mrb[0].mxu0 %vm357_vm0, %v3187_v38  ;;  %v2934_v51 = vpack.c.bf16 %v342_v49, %v332_v46 }
  0x1d   : > { %2832 = vmatmul.mubr.msk.f32.vlgmr.msra.gmra.mrb[0].mxu1 %vm357_vm0, %v3187_v38  ;;  %455 = vmatprep.mubr.f32.mxu0 %v4791_v0  ;;  %v2938_v63 = vpack.c.bf16 %v344_v62, %v334_v61 }
  0x1e   : > { %574 = vmatprep.mubr.f32.mxu1 %v4791_v0  ;;  %2931 = vmatpush1.bf16.msra.mxu0 %v2930_v45 }
  0x1f   : > { %2937 = vmatprep.subr.bf16.mxu0 %v2936_v47  ;;  %2933 = vmatprep.subr.bf16.mxu1 %v2932_v48 }
  0x20   : > { %2824 = vmatmul.mubr.msk.f32.gmra.mrb[2].mxu0 %vm357_vm0, %v3199_v50  ;;  %2935 = vmatpush1.bf16.msra.mxu1 %v2934_v51 }
  0x21   : > { %461 = vmatprep.mubr.f32.mxu0 %v4791_v0  ;;  %2833 = vmatmul.mubr.msk.f32.gmra.mrb[2].mxu1 %vm357_vm0, %v3199_v50 }
  0x22   : > { %580 = vmatprep.mubr.f32.mxu1 %v4791_v0 }
  0x24   : > { %2825 = vmatmul.mubr.msk.f32.gmra.mrb[4].mxu0 %vm357_vm0, %v3208_v52 }
  0x25   : > { %467 = vmatprep.mubr.f32.mxu0 %v4791_v0  ;;  %2834 = vmatmul.mubr.msk.f32.gmra.mrb[4].mxu1 %vm357_vm0, %v3208_v52 }
  0x26   : > { %586 = vmatprep.mubr.f32.mxu1 %v4791_v0 }
  0x28   : > { %2826 = vmatmul.mubr.msk.f32.gmra.mrb[6].mxu0 %vm357_vm0, %v3219_v53 }
  0x29   : > { %473 = vmatprep.mubr.f32.mxu0 %v4791_v0  ;;  %2835 = vmatmul.mubr.msk.f32.gmra.mrb[6].mxu1 %vm357_vm0, %v3219_v53 }
  0x2a   : > { %592 = vmatprep.mubr.f32.mxu1 %v4791_v0 }
  0x2c   : > { %2827 = vmatmul.mubr.msk.f32.gmra.mrb[8].mxu0 %vm357_vm0, %v3230_v54 }
  0x2d   : > { %479 = vmatprep.mubr.f32.mxu0 %v4791_v0  ;;  %2836 = vmatmul.mubr.msk.f32.gmra.mrb[8].mxu1 %vm357_vm0, %v3230_v54 }
  0x2e   : > { %598 = vmatprep.mubr.f32.mxu1 %v4791_v0 }
  0x30   : > { %2828 = vmatmul.mubr.msk.f32.gmra.mrb[10].mxu0 %vm357_vm0, %v3241_v55 }
  0x31   : > { %485 = vmatprep.mubr.f32.mxu0 %v4791_v0  ;;  %2837 = vmatmul.mubr.msk.f32.gmra.mrb[10].mxu1 %vm357_vm0, %v3241_v55 }
  0x32   : > { %604 = vmatprep.mubr.f32.mxu1 %v4791_v0 }
  0x34   : > { %2829 = vmatmul.mubr.msk.f32.gmra.mrb[12].mxu0 %vm357_vm0, %v3252_v56 }
  0x35   : > { %491 = vmatprep.mubr.f32.mxu0 %v4791_v0  ;;  %2838 = vmatmul.mubr.msk.f32.gmra.mrb[12].mxu1 %vm357_vm0, %v3252_v56 }
  0x36   : > { %610 = vmatprep.mubr.f32.mxu1 %v4791_v0 }
  0x38   : > { %2830 = vmatmul.mubr.msk.f32.gmra.mrb[14].mxu0 %vm357_vm0, %v3263_v57 }
  0x39   : > { %497 = vmatprep.mubr.f32.mxu0 %v4791_v0  ;;  %2839 = vmatmul.mubr.msk.f32.gmra.mrb[14].mxu1 %vm357_vm0, %v3263_v57 }
  0x3a   : > { %616 = vmatprep.mubr.f32.mxu1 %v4791_v0 }
  0x3c   : > { %2831 = vmatmul.mubr.msk.f32.gmra.mrb[16].mxu0 %vm357_vm0, %v3276_v60 }
  0x3d   : > { %687 = vmatprep.mubr.f32.mxu0 %v4791_v0  ;;  %2840 = vmatmul.mubr.msk.f32.gmra.mrb[16].mxu1 %vm357_vm0, %v3276_v60 }
  0x3e   : > { %806 = vmatprep.mubr.f32.mxu1 %v4791_v0 }
  0x40   : > { %2841 = vmatmul.mubr.msk.f32.vlgmr.msra.gmra.mrb[18].mxu0 %vm357_vm0, %v3187_v38 }
  0x41   : > { %693 = vmatprep.mubr.f32.mxu0 %v4791_v0  ;;  %2939 = vmatpush1.bf16.msra.mxu0 %v2938_v63 }
  0x42   : > { %2850 = vmatmul.mubr.msk.f32.vlgmr.msra.gmra.mrb[18].mxu1 %vm357_vm0, %v3187_v38 }
  0x43   : > { %812 = vmatprep.mubr.f32.mxu1 %v4791_v0 }
  0x44   : > { %2842 = vmatmul.mubr.msk.f32.gmra.mrb[20].mxu0 %vm357_vm0, %v3199_v50 }
  0x45   : > { %699 = vmatprep.mubr.f32.mxu0 %v4791_v0 }
  0x46   : > { %2851 = vmatmul.mubr.msk.f32.gmra.mrb[20].mxu1 %vm357_vm0, %v3199_v50 }
  0x47   : > { %818 = vmatprep.mubr.f32.mxu1 %v4791_v0 }
  0x48   : > { %2843 = vmatmul.mubr.msk.f32.gmra.mrb[22].mxu0 %vm357_vm0, %v3208_v52 }
  0x49   : > { %705 = vmatprep.mubr.f32.mxu0 %v4791_v0 }
  0x4a   : > { %2852 = vmatmul.mubr.msk.f32.gmra.mrb[22].mxu1 %vm357_vm0, %v3208_v52 }
  0x4b   : > { %824 = vmatprep.mubr.f32.mxu1 %v4791_v0 }
  0x4c   : > { %2844 = vmatmul.mubr.msk.f32.gmra.mrb[24].mxu0 %vm357_vm0, %v3219_v53 }
  0x4d   : > { %711 = vmatprep.mubr.f32.mxu0 %v4791_v0 }
  0x4e   : > { %2853 = vmatmul.mubr.msk.f32.gmra.mrb[24].mxu1 %vm357_vm0, %v3219_v53 }
  0x4f   : > { %830 = vmatprep.mubr.f32.mxu1 %v4791_v0 }
  0x50   : > { %2845 = vmatmul.mubr.msk.f32.gmra.mrb[26].mxu0 %vm357_vm0, %v3230_v54 }
  0x51   : > { %717 = vmatprep.mubr.f32.mxu0 %v4791_v0 }
  0x52   : > { %2854 = vmatmul.mubr.msk.f32.gmra.mrb[26].mxu1 %vm357_vm0, %v3230_v54 }
  0x53   : > { %836 = vmatprep.mubr.f32.mxu1 %v4791_v0 }
  0x54   : > { %2846 = vmatmul.mubr.msk.f32.gmra.mrb[28].mxu0 %vm357_vm0, %v3241_v55 }
  0x55   : > { %723 = vmatprep.mubr.f32.mxu0 %v4791_v0 }
  0x56   : > { %2855 = vmatmul.mubr.msk.f32.gmra.mrb[28].mxu1 %vm357_vm0, %v3241_v55 }
  0x57   : > { %842 = vmatprep.mubr.f32.mxu1 %v4791_v0 }
  0x58   : > { %2847 = vmatmul.mubr.msk.f32.gmra.mrb[30].mxu0 %vm357_vm0, %v3252_v56 }
  0x59   : > { %729 = vmatprep.mubr.f32.mxu0 %v4791_v0 }
  0x5a   : > { %2856 = vmatmul.mubr.msk.f32.gmra.mrb[30].mxu1 %vm357_vm0, %v3252_v56 }
  0x5b   : > { %848 = vmatprep.mubr.f32.mxu1 %v4791_v0 }
  0x5c   : > { %2848 = vmatmul.mubr.msk.f32.gmra.mrb[32].mxu0 %vm357_vm0, %v3263_v57 }
  0x5d   : > { %735 = vmatprep.mubr.f32.mxu0 %v4791_v0 }
  0x5e   : > { %2857 = vmatmul.mubr.msk.f32.gmra.mrb[32].mxu1 %vm357_vm0, %v3263_v57 }
  0x5f   : > { %854 = vmatprep.mubr.f32.mxu1 %v4791_v0 }
  0x60   : > { %2849 = vmatmul.mubr.msk.f32.gmra.mrb[34].mxu0 %vm357_vm0, %v3276_v60 }
  0x61   : > { %925 = vmatprep.mubr.f32.mxu0 %v4791_v0 }
  0x62   : > { %2858 = vmatmul.mubr.msk.f32.gmra.mrb[34].mxu1 %vm357_vm0, %v3276_v60 }
  0x63   : > { %1499 = vmatprep.mubr.f32.mxu1 %v4791_v0 }
  0x64   : > { %2859 = vmatmul.mubr.msk.f32.vlgmr.msra.gmra.mrb[36].mxu0 %vm357_vm0, %v3187_v38 }
  0x65   : > { %931 = vmatprep.mubr.f32.mxu0 %v4791_v0 }
  0x68   : > { %2860 = vmatmul.mubr.msk.f32.gmra.mrb[38].mxu0 %vm357_vm0, %v3199_v50 }
  0x69   : > { %937 = vmatprep.mubr.f32.mxu0 %v4791_v0 }
  0x6c   : > { %2861 = vmatmul.mubr.msk.f32.gmra.mrb[40].mxu0 %vm357_vm0, %v3208_v52 }
  0x6d   : > { %943 = vmatprep.mubr.f32.mxu0 %v4791_v0 }
  0x70   : > { %2862 = vmatmul.mubr.msk.f32.gmra.mrb[42].mxu0 %vm357_vm0, %v3219_v53 }
  0x71   : > { %949 = vmatprep.mubr.f32.mxu0 %v4791_v0 }
  0x74   : > { %2863 = vmatmul.mubr.msk.f32.gmra.mrb[44].mxu0 %vm357_vm0, %v3230_v54 }
  0x75   : > { %955 = vmatprep.mubr.f32.mxu0 %v4791_v0 }
  0x78   : > { %2864 = vmatmul.mubr.msk.f32.gmra.mrb[46].mxu0 %vm357_vm0, %v3241_v55 }
  0x79   : > { %961 = vmatprep.mubr.f32.mxu0 %v4791_v0 }
  0x7c   : > { %2865 = vmatmul.mubr.msk.f32.gmra.mrb[48].mxu0 %vm357_vm0, %v3252_v56 }
  0x7d   : > { %967 = vmatprep.mubr.f32.mxu0 %v4791_v0 }
  0x80   : > { %2866 = vmatmul.mubr.msk.f32.gmra.mrb[50].mxu0 %vm357_vm0, %v3263_v57 }
  0x81   : > { %973 = vmatprep.mubr.f32.mxu0 %v4791_v0 }
  0x84   : > { %2867 = vmatmul.mubr.msk.f32.gmra.mrb[52].mxu0 %vm357_vm0, %v3276_v60 }
  0x85   : > { %1618 = vmatprep.mubr.f32.mxu0 %v4791_v0 }
  0xef   : > { %v451_v1 = vpop.f32.mrb[0].mxu0 }
  0xf0   : > { %v570_v2 = vpop.f32.mrb[0].mxu1  ;;  %980 = vrot.lane.b32.xlu0 %v451_v1, %s3078_s11  ;;  %v453_v3 = vpop.f32.mrb[1].mxu0 }
  0xf1   : > { %984 = vrot.lane.b32.xlu1 %v570_v2, %s3078_s11  ;;  %v572_v4 = vpop.f32.mrb[1].mxu1 }
  0xf3   : > { %v457_v5 = vpop.f32.mrb[2].mxu0 }
  0xf4   : > { %982 = vrot.lane.b32.xlu0 %v453_v3, %s3078_s11  ;;  %v459_v6 = vpop.f32.mrb[3].mxu0  ;;  %v576_v7 = vpop.f32.mrb[2].mxu1 }
  0xf5   : > { %1013 = vrot.lane.b32.xlu1 %v457_v5, %s3079_s13  ;;  %v578_v8 = vpop.f32.mrb[3].mxu1 }
  0xf7   : > { %v463_v9 = vpop.f32.mrb[4].mxu0 }
  0xf8   : > { %986 = vrot.lane.b32.xlu0 %v572_v4, %s3078_s11  ;;  %v465_v12 = vpop.f32.mrb[5].mxu0  ;;  %v582_v13 = vpop.f32.mrb[4].mxu1 }
  0xf9   : > { %1017 = vrot.lane.b32.xlu1 %v576_v7, %s3079_s13  ;;  %v584_v14 = vpop.f32.mrb[5].mxu1 }
  0xfb   : > { %v469_v18 = vpop.f32.mrb[6].mxu0 }
  0xfc   : > { %1019 = vrot.lane.b32.xlu0 %v578_v8, %s3079_s13  ;;  %v471_v19 = vpop.f32.mrb[7].mxu0  ;;  %v588_v20 = vpop.f32.mrb[6].mxu1 }
  0xfd   : > { %1015 = vrot.lane.b32.xlu1 %v459_v6, %s3079_s13  ;;  %v590_v21 = vpop.f32.mrb[7].mxu1 }
  0xff   : > { %v3376_v23 = vpop.f32.mrb[8].mxu0 }
 0x100   : > { %1054 = vrot.lane.b32.xlu0 %v463_v9, %s3080_s14  ;;  %v3379_v24 = vpop.f32.mrb[9].mxu0  ;;  %v3381_v25 = vpop.f32.mrb[8].mxu1 }
 0x101   : > { %1058 = vrot.lane.b32.xlu1 %v582_v13, %s3080_s14  ;;  %v3384_v26 = vpop.f32.mrb[9].mxu1 }
 0x103   : > { %v481_v27 = vpop.f32.mrb[10].mxu0 }
 0x104   : > { %1060 = vrot.lane.b32.xlu0 %v584_v14, %s3080_s14  ;;  %v483_v28 = vpop.f32.mrb[11].mxu0  ;;  %v600_v29 = vpop.f32.mrb[10].mxu1 }
 0x105   : > { %1056 = vrot.lane.b32.xlu1 %v465_v12, %s3080_s14  ;;  %v3388_v30 = vpop.f32.mrb[11].mxu1 }
 0x107   : > { %v487_v31 = vpop.f32.mrb[12].mxu0 }
 0x108   : > { %1097 = vrot.lane.b32.xlu0 %v471_v19, %s3081_s15  ;;  %v489_v32 = vpop.f32.mrb[13].mxu0  ;;  %v606_v33 = vpop.f32.mrb[12].mxu1 }
 0x109   : > { %1095 = vrot.lane.b32.xlu1 %v469_v18, %s3081_s15  ;;  %v3392_v34 = vpop.f32.mrb[13].mxu1 }
 0x10b   : > { %v493_v35 = vpop.f32.mrb[14].mxu0 }
 0x10c   : > { %1101 = vrot.lane.b32.xlu0 %v590_v21, %s3081_s15  ;;  %v495_v36 = vpop.f32.mrb[15].mxu0  ;;  %v612_v37 = vpop.f32.mrb[14].mxu1 }
 0x10d   : > { %1099 = vrot.lane.b32.xlu1 %v588_v20, %s3081_s15  ;;  %v3396_v38 = vpop.f32.mrb[15].mxu1 }
 0x10f   : > { %v499_v39 = vpop.f32.mrb[16].mxu0 }
 0x110   : > { %1146 = vrot.lane.b32.xlu0 %v481_v27, %s3082_s16  ;;  %v501_v40 = vpop.f32.mrb[17].mxu0  ;;  %v618_v41 = vpop.f32.mrb[16].mxu1 }
 0x111   : > { %1150 = vrot.lane.b32.xlu1 %v600_v29, %s3082_s16  ;;  %v3400_v42 = vpop.f32.mrb[17].mxu1 }
 0x113   : > { %v689_v43 = vpop.f32.mrb[18].mxu0 }
 0x114   : > { %1148 = vrot.lane.b32.xlu0 %v483_v28, %s3082_s16  ;;  %v691_v44 = vpop.f32.mrb[19].mxu0 }
 0x115   : > { %1189 = vrot.lane.b32.xlu1 %v489_v32, %s3083_s17  ;;  %v3404_v45 = vpop.f32.mrb[18].mxu1 }
 0x116   : > { %v3406_v46 = vpop.f32.mrb[19].mxu1 }
 0x117   : > { %v695_v47 = vpop.f32.mrb[20].mxu0 }
 0x118   : > { %1191 = vrot.lane.b32.xlu0 %v606_v33, %s3083_s17  ;;  %v697_v48 = vpop.f32.mrb[21].mxu0 }
 0x119   : > { %1228 = vrot.lane.b32.xlu1 %v493_v35, %s3084_s18  ;;  %v3410_v49 = vpop.f32.mrb[20].mxu1 }
 0x11a   : > { %v3412_v50 = vpop.f32.mrb[21].mxu1 }
 0x11b   : > { %v701_v51 = vpop.f32.mrb[22].mxu0 }
 0x11c   : > { %1187 = vrot.lane.b32.xlu0 %v487_v31, %s3083_s17  ;;  %v703_v52 = vpop.f32.mrb[23].mxu0 }
 0x11d   : > { %1230 = vrot.lane.b32.xlu1 %v495_v36, %s3084_s18  ;;  %v3416_v53 = vpop.f32.mrb[22].mxu1 }
 0x11e   : > { %v3418_v54 = vpop.f32.mrb[23].mxu1 }
 0x11f   : > { %v707_v55 = vpop.f32.mrb[24].mxu0 }
 0x120   : > { %1232 = vrot.lane.b32.xlu0 %v612_v37, %s3084_s18  ;;  %v709_v56 = vpop.f32.mrb[25].mxu0 }
 0x121   : > { %1273 = vrot.lane.b32.xlu1 %v618_v41, %s3085_s19  ;;  %v3422_v57 = vpop.f32.mrb[24].mxu1 }
 0x122   : > { %v3424_v58 = vpop.f32.mrb[25].mxu1 }
 0x123   : > { %v3426_v59 = vpop.f32.mrb[26].mxu0 }
 0x124   : > { %1269 = vrot.lane.b32.xlu0 %v499_v39, %s3085_s19  ;;  %v3429_v60 = vpop.f32.mrb[27].mxu0 }
 0x125   : > { %988 = vrot.lane.b32.xlu1 %v689_v43, %s3078_s11  ;;  %v3432_v61 = vpop.f32.mrb[26].mxu1 }
 0x126   : > { %v3434_v62 = vpop.f32.mrb[27].mxu1 }
 0x127   : > { %v719_v63 = vpop.f32.mrb[28].mxu0 }
 0x128   : > { %1271 = vrot.lane.b32.xlu0 %v501_v40, %s3085_s19  ;;  %v721_v1 = vpop.f32.mrb[29].mxu0 }
 0x129   : > { %1021 = vrot.lane.b32.xlu1 %v695_v47, %s3079_s13  ;;  %v838_v2 = vpop.f32.mrb[28].mxu1 }
 0x12a   : > { %v3438_v3 = vpop.f32.mrb[29].mxu1 }
 0x12b   : > { %v725_v4 = vpop.f32.mrb[30].mxu0 }
 0x12c   : > { %990 = vrot.lane.b32.xlu0 %v691_v44, %s3078_s11  ;;  %v727_v5 = vpop.f32.mrb[31].mxu0 }
 0x12d   : > { %1062 = vrot.lane.b32.xlu1 %v701_v51, %s3080_s14  ;;  %v844_v6 = vpop.f32.mrb[30].mxu1  ;;  %v3490_v51 = vpop.permute.xlu1 %1313 }
 0x12e   : > { %v3442_v7 = vpop.f32.mrb[31].mxu1 }
 0x12f   : > { %v731_v8 = vpop.f32.mrb[32].mxu0 }
 0x130   : > { %1023 = vrot.lane.b32.xlu0 %v697_v48, %s3079_s13  ;;  %v733_v9 = vpop.f32.mrb[33].mxu0 }
 0x131   : > { %v850_v12 = vpop.f32.mrb[32].mxu1 }
 0x132   : > { %v3445_v13 = vpop.f32.mrb[33].mxu1 }
 0x133   : > { %v737_v14 = vpop.f32.mrb[34].mxu0 }
 0x134   : > { %1064 = vrot.lane.b32.xlu0 %v703_v52, %s3080_s14  ;;  %v739_v18 = vpop.f32.mrb[35].mxu0 }
 0x135   : > { %v856_v19 = vpop.f32.mrb[34].mxu1 }
 0x136   : > { %v3448_v20 = vpop.f32.mrb[35].mxu1 }
 0x137   : > { %v927_v21 = vpop.f32.mrb[36].mxu0 }
 0x138   : > { %v929_v27 = vpop.f32.mrb[37].mxu0 }
 0x139   : > { %998 = vrot.lane.b32.xlu0 %v929_v27, %s3078_s11 }
 0x13b   : > { %v933_v28 = vpop.f32.mrb[38].mxu0 }
 0x13c   : > { %v935_v29 = vpop.f32.mrb[39].mxu0 }
 0x13d   : > { %1031 = vrot.lane.b32.xlu1 %v935_v29, %s3079_s13 }
 0x13f   : > { %v939_v31 = vpop.f32.mrb[40].mxu0 }
 0x140   : > { %v941_v32 = vpop.f32.mrb[41].mxu0 }
 0x141   : > { %1072 = vrot.lane.b32.xlu0 %v941_v32, %s3080_s14 }
 0x143   : > { %v945_v33 = vpop.f32.mrb[42].mxu0 }
 0x144   : > { %v947_v35 = vpop.f32.mrb[43].mxu0 }
 0x145   : > { %1105 = vrot.lane.b32.xlu0 %v709_v56, %s3081_s15  ;;  %1113 = vrot.lane.b32.xlu1 %v947_v35, %s3081_s15 }
 0x147   : > { %v3455_v36 = vpop.f32.mrb[44].mxu0 }
 0x148   : > { %v3457_v37 = vpop.f32.mrb[45].mxu0 }
 0x149   : > { %1154 = vrot.lane.b32.xlu0 %v719_v63, %s3082_s16  ;;  %1103 = vrot.lane.b32.xlu1 %v707_v55, %s3081_s15 }
 0x14b   : > { %v3461_v39 = vpop.f32.mrb[46].mxu0 }
 0x14c   : > { %v3463_v40 = vpop.f32.mrb[47].mxu0 }
 0x14d   : > { %1158 = vrot.lane.b32.xlu0 %v838_v2, %s3082_s16  ;;  %1152 = vrot.lane.b32.xlu1 %v3388_v30, %s3082_s16 }
 0x14f   : > { %v3468_v41 = vpop.f32.mrb[48].mxu0 }
 0x150   : > { %v3470_v43 = vpop.f32.mrb[49].mxu0 }
 0x151   : > { %1195 = vrot.lane.b32.xlu0 %v725_v4, %s3083_s17  ;;  %1156 = vrot.lane.b32.xlu1 %v721_v1, %s3082_s16 }
 0x153   : > { %v3474_v44 = vpop.f32.mrb[50].mxu0 }
 0x154   : > { %v3476_v47 = vpop.f32.mrb[51].mxu0 }
 0x155   : > { %1199 = vrot.lane.b32.xlu0 %v844_v6, %s3083_s17  ;;  %1193 = vrot.lane.b32.xlu1 %v3392_v34, %s3083_s17  ;;  %v1000_v6 = vlaneseq }
 0x157   : > { %v3481_v48 = vpop.f32.mrb[52].mxu0 }
 0x158   : > { %v3483_v30 = vpop.f32.mrb[53].mxu0 }
 0x159   : > { %1236 = vrot.lane.b32.xlu0 %v731_v8, %s3084_s18  ;;  %1197 = vrot.lane.b32.xlu1 %v727_v5, %s3083_s17  ;;  %v3556_v8 = vand.u32 127, %v1000_v6 }
 0x15b   : > { %vm1033_vm1 = vcmp.lt.s32.totalorder %v3556_v8, 34  ;;  %vm1002_vm2 = vcmp.lt.s32.totalorder %v3556_v8, 35  ;;  %vm1074_vm3 = vcmp.lt.s32.totalorder %v3556_v8, 33  ;;  %vm1115_vm4 = vcmp.lt.s32.totalorder %v3556_v8, 1 }
 0x15c   : > { %vm1166_vm5 = vcmp.lt.s32.totalorder %v3556_v8, 127  ;;  %vm1207_vm6 = vcmp.lt.s32.totalorder %v3556_v8, 95  ;;  %vm1248_vm7 = vcmp.lt.s32.totalorder %v3556_v8, 94  ;;  %vm1289_vm8 = vcmp.lt.s32.totalorder %v3556_v8, 93 }
 0x15d   : > { %1240 = vrot.lane.b32.xlu0 %v850_v12, %s3084_s18  ;;  %1234 = vrot.lane.b32.xlu1 %v3396_v38, %s3084_s18 }
 0x161   : > { %1277 = vrot.lane.b32.xlu0 %v737_v14, %s3085_s19  ;;  %1238 = vrot.lane.b32.xlu1 %v733_v9, %s3084_s18 }
 0x162   : > { %v3494_v34 = vpop.permute.xlu0 %980 }
 0x163   : > { %v3496_v52 = vpop.permute.xlu1 %984 }
 0x165   : > { %1281 = vrot.lane.b32.xlu0 %v856_v19, %s3085_s19  ;;  %1275 = vrot.lane.b32.xlu1 %v3400_v42, %s3085_s19 }
 0x166   : > { %v3501_v55 = vpop.permute.xlu0 %982 }
 0x167   : > { %v3503_v56 = vpop.permute.xlu1 %1013  ;;  %v1011_v12 = vsel %vm1002_vm2, %v3494_v34, %v3501_v55  ;;  %v1010_v10 = vsel %vm1002_vm2, %v3501_v55, %v3496_v52 }
 0x169   : > { %994 = vrot.lane.b32.xlu0 %v3406_v46, %s3078_s11  ;;  %1279 = vrot.lane.b32.xlu1 %v739_v18, %s3085_s19 }
 0x16a   : > { %v3508_v38 = vpop.permute.xlu0 %986 }
 0x16b   : > { %v3510_v63 = vpop.permute.xlu1 %1017 }
 0x16d   : > { %1025 = vrot.lane.b32.xlu0 %v3410_v49, %s3079_s13  ;;  %992 = vrot.lane.b32.xlu1 %v3404_v45, %s3078_s11 }
 0x16e   : > { %v3516_v42 = vpop.permute.xlu0 %1019 }
 0x16f   : > { %v3518_v1 = vpop.permute.xlu1 %1015 }
 0x171   : > { %1029 = vrot.lane.b32.xlu0 %v933_v28, %s3079_s13  ;;  %996 = vrot.lane.b32.xlu1 %v927_v21, %s3078_s11 }
 0x172   : > { %v3522_v46 = vpop.permute.xlu0 %1054 }
 0x173   : > { %v3524_v2 = vpop.permute.xlu1 %1058 }
 0x175   : > { %1068 = vrot.lane.b32.xlu0 %v3418_v54, %s3080_s14  ;;  %1027 = vrot.lane.b32.xlu1 %v3412_v50, %s3079_s13 }
 0x176   : > { %v3530_v49 = vpop.permute.xlu0 %1060 }
 0x177   : > { %v3532_v45 = vpop.permute.xlu1 %1056 }
 0x178   : > { %v1083_v14 = vsel %vm1074_vm3, %v3522_v46, %v3532_v45 }
 0x179   : > { %1107 = vrot.lane.b32.xlu0 %v3422_v57, %s3081_s15  ;;  %1066 = vrot.lane.b32.xlu1 %v3416_v53, %s3080_s14 }
 0x17a   : > { %v3538_v4 = vpop.permute.xlu0 %1097 }
 0x17b   : > { %v3540_v5 = vpop.permute.xlu1 %1095 }
 0x17d   : > { %1111 = vrot.lane.b32.xlu0 %v945_v33, %s3081_s15  ;;  %1070 = vrot.lane.b32.xlu1 %v939_v31, %s3080_s14 }
 0x17e   : > { %v3544_v54 = vpop.permute.xlu0 %1101 }
 0x17f   : > { %v3546_v50 = vpop.permute.xlu1 %1099 }
 0x180   : > { %v1122_v55 = vsel %vm1115_vm4, %v3546_v50, %v3544_v54 }
 0x181   : > { %1201 = vrot.lane.b32.xlu0 %v3442_v7, %s3083_s17  ;;  %1109 = vrot.lane.b32.xlu1 %v3424_v58, %s3081_s15  ;;  %v1042_v58 = vsel %vm1033_vm1, %v3503_v56, %v3518_v1 }
 0x182   : > { %v3552_v53 = vpop.permute.xlu0 %1146  ;;  %v1045_v18 = vadd.f32 %v1042_v58, %v1011_v12  ;;  %v3644_v12 = vld [vmem:[%s4782_s1] sm:$0xff] }
 0x183   : > { %v3554_v57 = vpop.permute.xlu1 %1150 }
 0x185   : > { %1283 = vrot.lane.b32.xlu0 %v3448_v20, %s3085_s19  ;;  %1160 = vrot.lane.b32.xlu1 %v3438_v3, %s3082_s16  ;;  %v1086_v20 = vadd.f32 %v1083_v14, %v1045_v18 }
 0x186   : > { %v3563_v9 = vpop.permute.xlu0 %1148 }
 0x187   : > { %v3565_v7 = vpop.permute.xlu1 %1189  ;;  %v1174_v29 = vsel %vm1166_vm5, %v3563_v9, %v3554_v57 }
 0x189   : > { %1242 = vrot.lane.b32.xlu1 %v3445_v13, %s3084_s18  ;;  %1162 = vrot.lane.b32.xlu0 %v3461_v39, %s3082_s16  ;;  %v1124_v13 = vsel %vm1115_vm4, %v3540_v5, %v3538_v4 }
 0x18a   : > { %v3578_v3 = vpop.permute.xlu0 %1191  ;;  %v1127_v27 = vadd.f32 %v1124_v13, %v1086_v20 }
 0x18b   : > { %v3592_v19 = vpop.permute.xlu1 %1228  ;;  %v1215_v33 = vsel %vm1207_vm6, %v3565_v7, %v3578_v3 }
 0x18c   : > { %v1137_v32 = vadd.f32 %v1127_v27, %v3379_v24 }
 0x18d   : > { %1164 = vrot.lane.b32.xlu1 %v3463_v40, %s3082_s16  ;;  %1205 = vrot.lane.b32.xlu0 %v3470_v43, %s3083_s17  ;;  %v3624_v40 = vshrl.u32 %v1000_v6, 7 }
 0x18e   : > { %v3598_v21 = vpop.permute.xlu0 %1187  ;;  %v1178_v35 = vadd.f32 %v1174_v29, %v1137_v32 }
 0x18f   : > { %v1231_v31 = vpop.permute.xlu1 %1230  ;;  %v4790_v6 = vsub.s32 1, %v3624_v40 }
 0x191   : > { %1203 = vrot.lane.b32.xlu1 %v3468_v41, %s3083_s17  ;;  %1244 = vrot.lane.b32.xlu0 %v3474_v44, %s3084_s18  ;;  %v1219_v41 = vadd.f32 %v1215_v33, %v1178_v35  ;;  %v1345_v13 = vrot.slane %v3644_v12, %v4790_v6 }
 0x192   : > { %v3606_v28 = vpop.permute.xlu0 %1232 }
 0x193   : > { %v1256_v24 = vsel %vm1248_vm7, %v1231_v31, %v3606_v28  ;;  %v3630_v43 = vpop.permute.xlu1 %1273 }
 0x194   : > { %v1260_v44 = vadd.f32 %v1256_v24, %v1219_v41 }
 0x195   : > { %1246 = vrot.lane.b32.xlu1 %v3476_v47, %s3084_s18  ;;  %1287 = vrot.lane.b32.xlu0 %v3483_v30, %s3085_s19  ;;  %v2350_v30 = vld [vmem:[%s4786_s5] sm:$0xff] }
 0x196   : > { %v3622_v39 = vpop.permute.xlu0 %1269 }
 0x197   : > { %v3652_v20 = vpop.permute.xlu1 %988 }
 0x199   : > { %1285 = vrot.lane.b32.xlu1 %v3481_v48, %s3085_s19 }
 0x19a   : > { %v1272_v47 = vpop.permute.xlu0 %1271 }
 0x19b   : > { %v1297_v58 = vsel %vm1289_vm8, %v1272_v47, %v3630_v43  ;;  %v1022_v33 = vpop.permute.xlu1 %1021 }
 0x19c   : > { %v1301_v14 = vadd.f32 %v1297_v58, %v1260_v44 }
 0x19d   : > { %2353 = vperm.xlu1 %3050, %v2350_v30  }
 0x19e   : > { %v3646_v48 = vpop.permute.xlu0 %990  ;;  %v1317_v18 = vadd.f32 %v3490_v51, %v1301_v14 }
 0x19f   : > { %v1063_v24 = vpop.permute.xlu1 %1062 }
 0x1a0   : > { %v1327_v27 = vmax.f32 %v1317_v18, 0.0 }
 0x1a2   : > { %v1389_v29 = vmul.f32 %v1345_v13, %v1327_v27  ;;  %v3654_v32 = vpop.permute.xlu0 %1023 }
 0x1a4   : > { %1435 = vmatprep.subr.mxu1 %v1389_v29 }
 0x1a6   : > { %v3656_v35 = vpop.permute.xlu0 %1064 }
 0x1ab   : > { %v3658_v41 = vpop.permute.xlu0 %998 }
 0x1ac   : > { %v1012_v14 = vsel %vm1002_vm2, %v3658_v41, %v3494_v34 }
 0x1af   : > { %v3660_v44 = vpop.permute.xlu1 %1031 }
 0x1b0   : > { %v1043_v30 = vsel %vm1033_vm1, %v3660_v44, %v3503_v56 }
 0x1b1   : > { %v1044_v13 = vadd.f32 %v1043_v30, %v1012_v14  ;;  %v1216_v14 = vsel %vm1207_vm6, %v3598_v21, %v3565_v7  ;;  %v1009_v7 = vsel %vm1002_vm2, %v3496_v52, %v3508_v38  ;;  %v1123_v52 = vsel %vm1115_vm4, %v3538_v4, %v3546_v50 }
 0x1b2   : > { %v1008_v4 = vsel %vm1002_vm2, %v3508_v38, %v3652_v20  ;;  %v1007_v50 = vsel %vm1002_vm2, %v3652_v20, %v3646_v48  ;;  %v3775_v20 = vld [vmem:[%s4785_s4 + $0x8] sm:$0xff] }
 0x1b3   : > { %v3666_v58 = vpop.permute.xlu0 %1072 }
 0x1b4   : > { %v1084_v18 = vsel %vm1074_vm3, %v3666_v58, %v3522_v46  ;;  %v1175_v46 = vsel %vm1166_vm5, %v3552_v53, %v3563_v9  ;;  %v1298_v9 = vsel %vm1289_vm8, %v3622_v39, %v1272_v47 }
 0x1b5   : > { %v1085_v27 = vadd.f32 %v1084_v18, %v1044_v13 }
 0x1b7   : > { %v3676_v29 = vpop.permute.xlu0 %1105  ;;  %v3678_v15 = vpop.permute.xlu1 %1113 }
 0x1b8   : > { %v1125_v56 = vsel %vm1115_vm4, %v3678_v15, %v3540_v5 }
 0x1b9   : > { %v1126_v22 = vadd.f32 %v1125_v56, %v1085_v27  ;;  %v1340_v27 = vsub.s32 0, %v3624_v40 }
 0x1bb   : > { %v1136_v6 = vadd.f32 %v1126_v22, %v3376_v23  ;;  %v3685_v34 = vpop.permute.xlu0 %1154  ;;  %v1104_v0 = vpop.permute.xlu1 %1103  ;;  %v1257_v22 = vsel %vm1248_vm7, %v3592_v19, %v1231_v31  ;;  %v1040_v31 = vsel %vm1033_vm1, %v3510_v63, %v3516_v42  ;;  %v1341_v47 = vrot.slane %v3644_v12, %v1340_v27 }
 0x1bd   : > { %v1177_v30 = vadd.f32 %v1175_v46, %v1136_v6 }
 0x1bf   : > { %v1218_v18 = vadd.f32 %v1216_v14, %v1177_v30  ;;  %v3695_v13 = vpop.permute.xlu0 %1158  ;;  %v1153_v5 = vpop.permute.xlu1 %1152  ;;  %v1041_v14 = vsel %vm1033_vm1, %v3518_v1, %v3510_v63  ;;  %v1082_v63 = vsel %vm1074_vm3, %v3532_v45, %v3524_v2 }
 0x1c0   : > { %v1046_v1 = vadd.f32 %v1041_v14, %v1010_v10  ;;  %v1039_v10 = vsel %vm1033_vm1, %v3516_v42, %v1022_v33  ;;  %v1080_v42 = vsel %vm1074_vm3, %v3530_v49, %v1063_v24 }
 0x1c1   : > { %v1259_v23 = vadd.f32 %v1257_v22, %v1218_v18  ;;  %v1047_v18 = vadd.f32 %v1040_v31, %v1009_v7  ;;  %v3739_v31 = vld [vmem:[%s4785_s4] sm:$0xff] }
 0x1c3   : > { %v3704_v6 = vpop.permute.xlu0 %1195  ;;  %v1157_v56 = vpop.permute.xlu1 %1156  ;;  %v1300_v46 = vadd.f32 %v1298_v9, %v1259_v23 }
 0x1c5   : > { %v1316_v30 = vadd.f32 %v3490_v51, %v1300_v46  ;;  %v1081_v46 = vsel %vm1074_vm3, %v3524_v2, %v3530_v49  ;;  %v1038_v2 = vsel %vm1033_vm1, %v1022_v33, %v3654_v32  ;;  %v1079_v33 = vsel %vm1074_vm3, %v1063_v24, %v3656_v35 }
 0x1c6   : > { %v1088_v45 = vadd.f32 %v1081_v46, %v1047_v18  ;;  %v1048_v46 = vadd.f32 %v1039_v10, %v1008_v4  ;;  %v1049_v38 = vadd.f32 %v1038_v2, %v1007_v50  ;;  %v1120_v49 = vsel %vm1115_vm4, %v1104_v0, %v3676_v29  ;;  %v3799_v4 = vld [vmem:[%s4785_s4 + $0x10] sm:$0xff] }
 0x1c7   : > { %v3722_v22 = vpop.permute.xlu0 %1199  ;;  %v1194_v23 = vpop.permute.xlu1 %1193  ;;  %v1326_v9 = vmax.f32 %v1316_v30, 0.0  ;;  %v1087_v30 = vadd.f32 %v1082_v63, %v1046_v1  ;;  %v4795_v63 = vmov 0.0   ;;  %v1121_v24 = vsel %vm1115_vm4, %v3544_v54, %v1104_v0 }
 0x1c8   : > { %v1089_v1 = vadd.f32 %v1080_v42, %v1048_v46  ;;  %v1172_v10 = vsel %vm1166_vm5, %v1153_v5, %v3685_v34  ;;  %v1173_v2 = vsel %vm1166_vm5, %v3554_v57, %v1153_v5  ;;  %v1213_v57 = vsel %vm1207_vm6, %v1194_v23, %v3704_v6 }
 0x1c9   : > { %v1388_v7 = vmul.f32 %v1341_v47, %v1326_v9  ;;  %v1128_v18 = vadd.f32 %v1123_v52, %v1087_v30  ;;  %v1129_v9 = vadd.f32 %v1122_v55, %v1088_v45  ;;  %v1214_v5 = vsel %vm1207_vm6, %v3578_v3, %v1194_v23 }
 0x1ca   : > { %v1130_v45 = vadd.f32 %v1121_v24, %v1089_v1 }
 0x1cb   : > { %v1237_v47 = vpop.permute.xlu0 %1236  ;;  %1436 = vmatpush1.msra.mxu1 %v1388_v7  ;;  %v1198_v14 = vpop.permute.xlu1 %1197  ;;  %v1090_v7 = vadd.f32 %v1079_v33, %v1049_v38  ;;  %v1138_v0 = vadd.f32 %v1128_v18, %v3381_v25  ;;  %v1139_v54 = vadd.f32 %v1129_v9, %v3384_v26  ;;  %v1170_v26 = vsel %vm1166_vm5, %v1157_v56, %v3695_v13 }
 0x1cc   : > { %2868 = vmatmul.mubr.msk.f32.vlgmr.msra.gmra.mrb[36].mxu1 %vm1407_vm9, %v3739_v31  ;;  %v1171_v18 = vsel %vm1166_vm5, %v3685_v34, %v1157_v56  ;;  %v1140_v3 = vadd.f32 %v1130_v45, %v3426_v59  ;;  %v3826_v34 = vld [vmem:[%s4785_s4 + $0x18] sm:$0xff]  ;;  %v1212_v56 = vsel %vm1207_vm6, %v3704_v6, %v1198_v14  ;;  %v1352_v59 = vsub.s32 3, %v3624_v40 }
 0x1cd   : > { %1505 = vmatprep.mubr.f32.mxu1 %v4795_v63  ;;  %v1131_v30 = vadd.f32 %v1120_v49, %v1090_v7  ;;  %v1179_v50 = vadd.f32 %v1173_v2, %v1138_v0  ;;  %v1180_v42 = vadd.f32 %v1172_v10, %v1139_v54 }
 0x1ce   : > { %v1181_v24 = vadd.f32 %v1171_v18, %v1140_v3 }
 0x1cf   : > { %v3783_v52 = vpop.permute.xlu0 %1240  ;;  %v1235_v55 = vpop.permute.xlu1 %1234  ;;  %v1141_v23 = vadd.f32 %v1131_v30, %v3429_v60  ;;  %v1220_v38 = vadd.f32 %v1214_v5, %v1179_v50  ;;  %v1221_v49 = vadd.f32 %v1213_v57, %v1180_v42  ;;  %v1348_v60 = vsub.s32 2, %v3624_v40 }
 0x1d0   : > { %2869 = vmatmul.mubr.msk.f32.gmra.mrb[38].mxu1 %vm1407_vm9, %v3775_v20  ;;  %v1254_v9 = vsel %vm1248_vm7, %v1235_v55, %v1237_v47  ;;  %v1255_v46 = vsel %vm1248_vm7, %v3606_v28, %v1235_v55  ;;  %v1211_v28 = vsel %vm1207_vm6, %v1198_v14, %v3722_v22  ;;  %v1222_v0 = vadd.f32 %v1212_v56, %v1181_v24  ;;  %v3875_v24 = vld [vmem:[%s4785_s4 + $0x28] sm:$0xff] }
 0x1d1   : > { %1511 = vmatprep.mubr.f32.mxu1 %v4795_v63  ;;  %v1182_v1 = vadd.f32 %v1170_v26, %v1141_v23  ;;  %v1261_v7 = vadd.f32 %v1255_v46, %v1220_v38  ;;  %v1262_v55 = vadd.f32 %v1254_v9, %v1221_v49  ;;  %v1353_v50 = vrot.slane %v3644_v12, %v1352_v59 }
 0x1d2   : > { %v1349_v42 = vrot.slane %v3644_v12, %v1348_v60 }
 0x1d3   : > { %v1278_v25 = vpop.permute.xlu0 %1277  ;;  %v1239_v33 = vpop.permute.xlu1 %1238  ;;  %v1223_v54 = vadd.f32 %v1211_v28, %v1182_v1 }
 0x1d4   : > { %2870 = vmatmul.mubr.msk.f32.gmra.mrb[40].mxu1 %vm1407_vm9, %v3799_v4  ;;  %v1252_v45 = vsel %vm1248_vm7, %v1239_v33, %v3783_v52  ;;  %v1253_v30 = vsel %vm1248_vm7, %v1237_v47, %v1239_v33  ;;  %v3854_v47 = vld [vmem:[%s4785_s4 + $0x20] sm:$0xff]  ;;  %v1356_v33 = vsub.s32 4, %v3624_v40 }
 0x1d5   : > { %1517 = vmatprep.mubr.f32.mxu1 %v4795_v63  ;;  %v1263_v26 = vadd.f32 %v1253_v30, %v1222_v0  ;;  %v1264_v18 = vadd.f32 %v1252_v45, %v1223_v54  ;;  %v3891_v54 = vld [vmem:[%s4785_s4 + $0x30] sm:$0xff] }
 0x1d7   : > { %v3836_v10 = vpop.permute.xlu0 %1281  ;;  %v1276_v2 = vpop.permute.xlu1 %1275 }
 0x1d8   : > { %v1295_v6 = vsel %vm1289_vm8, %v1276_v2, %v1278_v25  ;;  %v1296_v14 = vsel %vm1289_vm8, %v3630_v43, %v1276_v2  ;;  %2871 = vmatmul.mubr.msk.f32.gmra.mrb[42].mxu1 %vm1407_vm9, %v3826_v34  ;;  %v1360_v43 = vsub.s32 5, %v3624_v40 }
 0x1d9   : > { %v1302_v57 = vadd.f32 %v1296_v14, %v1261_v7  ;;  %v1303_v5 = vadd.f32 %v1295_v6, %v1262_v55  ;;  %1523 = vmatprep.mubr.f32.mxu1 %v4795_v63  ;;  %v1357_v7 = vrot.slane %v3644_v12, %v1356_v33 }
 0x1da   : > { %v1361_v1 = vrot.slane %v3644_v12, %v1360_v43  ;;  %v3902_v43 = vld [vmem:[%s4785_s4 + $0x38] sm:$0xff] }
 0x1db   : > { %v1318_v9 = vadd.f32 %v3490_v51, %v1302_v57  ;;  %v3861_v46 = vpop.permute.xlu0 %994  ;;  %v1280_v3 = vpop.permute.xlu1 %1279  ;;  %v1319_v23 = vadd.f32 %v3490_v51, %v1303_v5 }
 0x1dc   : > { %v1293_v38 = vsel %vm1289_vm8, %v1280_v3, %v3836_v10  ;;  %v1294_v49 = vsel %vm1289_vm8, %v1278_v25, %v1280_v3  ;;  %2872 = vmatmul.mubr.msk.f32.gmra.mrb[44].mxu1 %vm1407_vm9, %v3854_v47 }
 0x1dd   : > { %v1328_v28 = vmax.f32 %v1318_v9, 0.0  ;;  %v1304_v56 = vadd.f32 %v1294_v49, %v1263_v26  ;;  %v1305_v59 = vadd.f32 %v1293_v38, %v1264_v18  ;;  %v1329_v60 = vmax.f32 %v1319_v23, 0.0  ;;  %1529 = vmatprep.mubr.f32.mxu1 %v4795_v63  ;;  %v3913_v18 = vld [vmem:[%s4785_s4 + $0x40] sm:$0xff] }
 0x1df   : > { %v1320_v25 = vadd.f32 %v3490_v51, %v1304_v56  ;;  %v3880_v55 = vpop.permute.xlu0 %1025  ;;  %v3882_v2 = vpop.permute.xlu1 %992  ;;  %v1391_v45 = vmul.f32 %v1353_v50, %v1329_v60  ;;  %v1390_v30 = vmul.f32 %v1349_v42, %v1328_v28  ;;  %v1321_v6 = vadd.f32 %v3490_v51, %v1305_v59 }
 0x1e0   : > { %2873 = vmatmul.mubr.msk.f32.gmra.mrb[46].mxu1 %vm1407_vm9, %v3875_v24  ;;  %v1037_v23 = vsel %vm1033_vm1, %v3654_v32, %v3880_v55  ;;  %v1006_v38 = vsel %vm1002_vm2, %v3646_v48, %v3882_v2 }
 0x1e1   : > { %v1330_v14 = vmax.f32 %v1320_v25, 0.0  ;;  %1554 = vmatprep.subr.mxu0 %v1391_v45  ;;  %v1331_v0 = vmax.f32 %v1321_v6, 0.0  ;;  %1535 = vmatprep.mubr.f32.mxu1 %v4795_v63  ;;  %v1050_v59 = vadd.f32 %v1037_v23, %v1006_v38 }
 0x1e2   : > { %1555 = vmatpush1.msra.mxu0 %v1390_v30 }
 0x1e3   : > { %v1030_v57 = vpop.permute.xlu0 %1029  ;;  %2877 = vmatmul.mubr.msk.f32.vlgmr.msra.gmra.mrb[54].mxu0 %vm1407_vm9, %v3739_v31  ;;  %v997_v5 = vpop.permute.xlu1 %996  ;;  %v1393_v50 = vmul.f32 %v1361_v1, %v1331_v0  ;;  %v1392_v42 = vmul.f32 %v1357_v7, %v1330_v14  ;;  %v1005_v14 = vsel %vm1002_vm2, %v3882_v2, %v3861_v46 }
 0x1e4   : > { %1624 = vmatprep.mubr.f32.mxu0 %v4795_v63  ;;  %2874 = vmatmul.mubr.msk.f32.gmra.mrb[48].mxu1 %vm1407_vm9, %v3891_v54  ;;  %v1034_v60 = vsel %vm1033_vm1, %v1030_v57, %v3660_v44  ;;  %v1003_v1 = vsel %vm1002_vm2, %v997_v5, %v3658_v41 }
 0x1e5   : > { %1673 = vmatprep.subr.mxu1 %v1393_v50  ;;  %1541 = vmatprep.mubr.f32.mxu1 %v4795_v63  ;;  %v1053_v45 = vadd.f32 %v1034_v60, %v1003_v1 }
 0x1e6   : > { %1674 = vmatpush1.msra.mxu1 %v1392_v42  ;;  %v1004_v42 = vsel %vm1002_vm2, %v3861_v46, %v997_v5 }
 0x1e7   : > { %v1069_v33 = vpop.permute.xlu0 %1068  ;;  %2878 = vmatmul.mubr.msk.f32.gmra.mrb[56].mxu0 %vm1407_vm9, %v3775_v20  ;;  %v1028_v26 = vpop.permute.xlu1 %1027 }
 0x1e8   : > { %1630 = vmatprep.mubr.f32.mxu0 %v4795_v63  ;;  %2875 = vmatmul.mubr.msk.f32.gmra.mrb[50].mxu1 %vm1407_vm9, %v3902_v43  ;;  %v1036_v6 = vsel %vm1033_vm1, %v3880_v55, %v1028_v26  ;;  %v1035_v55 = vsel %vm1033_vm1, %v1028_v26, %v1030_v57 }
 0x1e9   : > { %1547 = vmatprep.mubr.f32.mxu1 %v4795_v63  ;;  %v1052_v46 = vadd.f32 %v1035_v55, %v1004_v42 }
 0x1eb   : > { %v1108_v9 = vpop.permute.xlu0 %1107  ;;  %2879 = vmatmul.mubr.msk.f32.gmra.mrb[58].mxu0 %vm1407_vm9, %v3799_v4  ;;  %v1067_v3 = vpop.permute.xlu1 %1066 }
 0x1ec   : > { %1636 = vmatprep.mubr.f32.mxu0 %v4795_v63  ;;  %2876 = vmatmul.mubr.msk.f32.gmra.mrb[52].mxu1 %vm1407_vm9, %v3913_v18  ;;  %v1078_v49 = vsel %vm1074_vm3, %v3656_v35, %v1067_v3  ;;  %v1119_v7 = vsel %vm1115_vm4, %v3676_v29, %v1108_v9  ;;  %v1077_v0 = vsel %vm1074_vm3, %v1067_v3, %v1069_v33 }
 0x1ed   : > { %1737 = vmatprep.mubr.f32.mxu1 %v4795_v63  ;;  %v1091_v48 = vadd.f32 %v1078_v49, %v1050_v59 }
 0x1ef   : > { %v1112_v28 = vpop.permute.xlu0 %1111  ;;  %2880 = vmatmul.mubr.msk.f32.gmra.mrb[60].mxu0 %vm1407_vm9, %v3826_v34  ;;  %v1071_v56 = vpop.permute.xlu1 %1070  ;;  %v1132_v25 = vadd.f32 %v1119_v7, %v1091_v48 }
 0x1f0   : > { %1642 = vmatprep.mubr.f32.mxu0 %v4795_v63  ;;  %2886 = vmatmul.mubr.msk.f32.vlgmr.msra.gmra.mrb[54].mxu1 %vm1407_vm9, %v3739_v31  ;;  %v1075_v44 = vsel %vm1074_vm3, %v1071_v56, %v3666_v58  ;;  %v1116_v23 = vsel %vm1115_vm4, %v1112_v28, %v3678_v15  ;;  %v1076_v57 = vsel %vm1074_vm3, %v1069_v33, %v1071_v56 }
 0x1f1   : > { %1743 = vmatprep.mubr.f32.mxu1 %v4795_v63  ;;  %v1094_v29 = vadd.f32 %v1075_v44, %v1053_v45  ;;  %v1142_v50 = vadd.f32 %v1132_v25, %v3432_v61  ;;  %v1093_v49 = vadd.f32 %v1076_v57, %v1052_v46  ;;  %v347_v57 = vld [vmem:[%s4782_s1 + $0x8] sm:$0x3] }
 0x1f3   : > { %v3938_v32 = vpop.permute.xlu0 %1201  ;;  %2881 = vmatmul.mubr.msk.f32.gmra.mrb[62].mxu0 %vm1407_vm9, %v3854_v47  ;;  %v1110_v35 = vpop.permute.xlu1 %1109  ;;  %v1135_v15 = vadd.f32 %v1116_v23, %v1094_v29 }
 0x1f4   : > { %1648 = vmatprep.mubr.f32.mxu0 %v4795_v63  ;;  %2887 = vmatmul.mubr.msk.f32.gmra.mrb[56].mxu1 %vm1407_vm9, %v3775_v20  ;;  %v1118_v61 = vsel %vm1115_vm4, %v1108_v9, %v1110_v35  ;;  %v1117_v3 = vsel %vm1115_vm4, %v1110_v35, %v1112_v28  ;;  %v1210_v33 = vsel %vm1207_vm6, %v3722_v22, %v3938_v32 }
 0x1f5   : > { %1749 = vmatprep.mubr.f32.mxu1 %v4795_v63  ;;  %v1134_v28 = vadd.f32 %v1117_v3, %v1093_v49  ;;  %v1145_v35 = vadd.f32 %v1135_v15, %v3457_v37 }
 0x1f7   : > { %v3958_v30 = vpop.permute.xlu0 %1283  ;;  %2882 = vmatmul.mubr.msk.f32.gmra.mrb[64].mxu0 %vm1407_vm9, %v3875_v24  ;;  %v1161_v41 = vpop.permute.xlu1 %1160 }
 0x1f8   : > { %1654 = vmatprep.mubr.f32.mxu0 %v4795_v63  ;;  %2888 = vmatmul.mubr.msk.f32.gmra.mrb[58].mxu1 %vm1407_vm9, %v3799_v4  ;;  %v1169_v58 = vsel %vm1166_vm5, %v3695_v13, %v1161_v41  ;;  %v1051_v13 = vadd.f32 %v1036_v6, %v1005_v14 }
 0x1f9   : > { %1755 = vmatprep.mubr.f32.mxu1 %v4795_v63  ;;  %v1183_v26 = vadd.f32 %v1169_v58, %v1142_v50 }
 0x1fa   : > { %v1092_v5 = vadd.f32 %v1077_v0, %v1051_v13 }
 0x1fb   : > { %2883 = vmatmul.mubr.msk.f32.gmra.mrb[66].mxu0 %vm1407_vm9, %v3891_v54  ;;  %v1243_v2 = vpop.permute.xlu1 %1242  ;;  %v1163_v38 = vpop.permute.xlu0 %1162  ;;  %v1224_v48 = vadd.f32 %v1210_v33, %v1183_v26 }
 0x1fc   : > { %1660 = vmatprep.mubr.f32.mxu0 %v4795_v63  ;;  %2889 = vmatmul.mubr.msk.f32.gmra.mrb[60].mxu1 %vm1407_vm9, %v3826_v34  ;;  %v1133_v9 = vadd.f32 %v1118_v61, %v1092_v5  ;;  %v1251_v22 = vsel %vm1248_vm7, %v3783_v52, %v1243_v2  ;;  %v1168_v1 = vsel %vm1166_vm5, %v1161_v41, %v1163_v38  ;;  %v1368_v5 = vsub.s32 7, %v3624_v40 }
 0x1fd   : > { %1761 = vmatprep.mubr.f32.mxu1 %v4795_v63  ;;  %v1265_v45 = vadd.f32 %v1251_v22, %v1224_v48  ;;  %v1144_v52 = vadd.f32 %v1134_v28, %v3455_v36  ;;  %v1373_v48 = vrot.slane %v347_v57, %v1340_v27 }
 0x1fe   : > { %v1143_v7 = vadd.f32 %v1133_v9, %v3434_v62  ;;  %v1369_v22 = vrot.slane %v3644_v12, %v1368_v5 }
 0x1ff   : > { %v1165_v56 = vpop.permute.xlu1 %1164  ;;  %v1206_v59 = vpop.permute.xlu0 %1205  ;;  %2884 = vmatmul.mubr.msk.f32.gmra.mrb[68].mxu0 %vm1407_vm9, %v3902_v43 }
 0x200   : > { %v1176_v60 = vsel %vm1166_vm5, %v1165_v56, %v3552_v53  ;;  %1666 = vmatprep.mubr.f32.mxu0 %v4795_v63  ;;  %2890 = vmatmul.mubr.msk.f32.gmra.mrb[62].mxu1 %vm1407_vm9, %v3854_v47  ;;  %v1167_v6 = vsel %vm1166_vm5, %v1163_v38, %v1165_v56  ;;  %v1184_v62 = vadd.f32 %v1168_v1, %v1143_v7  ;;  %v4796_v56 = vsub.s32 1, %v3624_v40 }
 0x201   : > { %1767 = vmatprep.mubr.f32.mxu1 %v4795_v63  ;;  %v1186_v53 = vadd.f32 %v1176_v60, %v1145_v35  ;;  %v1217_v41 = vsel %vm1207_vm6, %v1206_v59, %v3598_v21  ;;  %v1185_v58 = vadd.f32 %v1167_v6, %v1144_v52  ;;  %v3056_v52 = vld [vmem:[%s3150_s12 + $0x38] sm:$0xff] }
 0x203   : > { %v1204_v25 = vpop.permute.xlu1 %1203  ;;  %v1245_v44 = vpop.permute.xlu0 %1244  ;;  %2885 = vmatmul.mubr.msk.f32.gmra.mrb[70].mxu0 %vm1407_vm9, %v3913_v18  ;;  %v1227_v14 = vadd.f32 %v1217_v41, %v1186_v53  ;;  %v3057_v41 = vld [vmem:[%s3150_s12 + $0x88] sm:$0xff] }
 0x204   : > { %v1209_v37 = vsel %vm1207_vm6, %v3938_v32, %v1204_v25  ;;  %2891 = vmatmul.mubr.msk.f32.gmra.mrb[64].mxu1 %vm1407_vm9, %v3875_v24  ;;  %1856 = vmatprep.mubr.f32.mxu0 %v4795_v63  ;;  %v1208_v29 = vsel %vm1207_vm6, %v1204_v25, %v1206_v59  ;;  %v1292_v32 = vsel %vm1289_vm8, %v3836_v10, %v3958_v30 }
 0x205   : > { %1773 = vmatprep.mubr.f32.mxu1 %v4795_v63  ;;  %v1225_v55 = vadd.f32 %v1209_v37, %v1184_v62  ;;  %v1306_v36 = vadd.f32 %v1292_v32, %v1265_v45  ;;  %v1226_v13 = vadd.f32 %v1208_v29, %v1185_v58  ;;  %v1250_v10 = vsel %vm1248_vm7, %v1243_v2, %v1245_v44  ;;  %v3053_v45 = vld [vmem:[%s3150_s12 + $0x68] sm:$0xff]  ;;  %v3055_v37 = vld [vmem:[%s3150_s12 + $0x58] sm:$0xff] }
 0x206   : > { %v1377_v59 = vrot.slane %v347_v57, %v4796_v56  ;;  %v2952_v29 = vpack.c.bf16 %v3057_v41, %v3056_v52  ;;  %v4797_v32 = vpack.c.bf16 %v3170_v17, %v3167_v16  ;;  %v3058_v58 = vld [vmem:[%s3150_s12 + $0x28] sm:$0xff]  ;;  %v3060_v16 = vld [vmem:[%s3150_s12 + $0x20] sm:$0xff]  ;;  %v3061_v17 = vld [vmem:[%s3150_s12 + $0x70] sm:$0xff] }
 0x207   : > { %v1247_v0 = vpop.permute.xlu1 %1246  ;;  %v1288_v50 = vpop.permute.xlu0 %1287  ;;  %v1266_v61 = vadd.f32 %v1250_v10, %v1225_v55  ;;  %v1322_v15 = vadd.f32 %v3490_v51, %v1306_v36 }
 0x208   : > { %v1249_v42 = vsel %vm1248_vm7, %v1245_v44, %v1247_v0  ;;  %v1258_v21 = vsel %vm1248_vm7, %v1247_v0, %v3592_v19  ;;  %2892 = vmatmul.mubr.msk.f32.gmra.mrb[66].mxu1 %vm1407_vm9, %v3891_v54  ;;  %v1299_v38 = vsel %vm1289_vm8, %v1288_v50, %v3622_v39  ;;  %v1364_v39 = vsub.s32 6, %v3624_v40  ;;  %v3052_v44 = vld [vmem:[%s3150_s12 + $0x18] sm:$0xff] }
 0x209   : > { %v1268_v23 = vadd.f32 %v1258_v21, %v1227_v14  ;;  %1779 = vmatprep.mubr.f32.mxu1 %v4795_v63  ;;  %v1267_v19 = vadd.f32 %v1249_v42, %v1226_v13  ;;  %v1332_v35 = vmax.f32 %v1322_v15, 0.0  ;;  %v2944_v6 = vpack.c.bf16 %v3053_v45, %v3052_v44  ;;  %v3059_v14 = vld [vmem:[%s3150_s12 + $0x78] sm:$0xff] }
 0x20a   : > { %v1365_v1 = vrot.slane %v3644_v12, %v1364_v39  ;;  %v3054_v12 = vld [vmem:[%s3150_s12 + $0x8] sm:$0xff]  ;;  %v2948_v55 = vpack.c.bf16 %v3059_v14, %v3058_v58 }
 0x20b   : > { %v1309_v26 = vadd.f32 %v1299_v38, %v1268_v23  ;;  %v1286_v46 = vpop.permute.xlu1 %1285  ;;  %v2940_v62 = vpack.c.bf16 %v3055_v37, %v3054_v12 }
 0x20c   : > { %v1290_v3 = vsel %vm1289_vm8, %v1286_v46, %v1288_v50  ;;  %v1291_v2 = vsel %vm1289_vm8, %v3958_v30, %v1286_v46  ;;  %2893 = vmatmul.mubr.msk.f32.gmra.mrb[68].mxu1 %vm1407_vm9, %v3902_v43  ;;  %v1394_v25 = vmul.f32 %v1365_v1, %v1332_v35  ;;  %v3067_v50 = vld [vmem:[%s3150_s12 + $0x90] sm:$0xff] }
 0x20d   : > { %v1325_v49 = vadd.f32 %v3490_v51, %v1309_v26  ;;  %v1307_v33 = vadd.f32 %v1291_v2, %v1266_v61  ;;  %v1308_v9 = vadd.f32 %v1290_v3, %v1267_v19  ;;  %1785 = vmatprep.mubr.f32.mxu1 %v4795_v63 }
 0x20f   : > { %v1335_v60 = vmax.f32 %v1325_v49, 0.0  ;;  %v1323_v30 = vadd.f32 %v3490_v51, %v1307_v33  ;;  %v1324_v28 = vadd.f32 %v3490_v51, %v1308_v9 }
 0x210   : > { %2894 = vmatmul.mubr.msk.f32.gmra.mrb[70].mxu1 %vm1407_vm9, %v3913_v18 }
 0x211   : > { %v1333_v7 = vmax.f32 %v1323_v30, 0.0  ;;  %v1334_v40 = vmax.f32 %v1324_v28, 0.0  ;;  %v1397_v27 = vmul.f32 %v1377_v59, %v1335_v60  ;;  %1975 = vmatprep.mubr.f32.mxu1 %v4795_v63 }
 0x213   : > { %1911 = vmatprep.subr.mxu1 %v1397_v27  ;;  %v1395_v53 = vmul.f32 %v1369_v22, %v1333_v7  ;;  %v1396_v51 = vmul.f32 %v1373_v48, %v1334_v40 }
 0x215   : > { %1792 = vmatprep.subr.mxu0 %v1395_v53  ;;  %1912 = vmatpush1.msra.mxu1 %v1396_v51 }
 0x216   : > { %1793 = vmatpush1.msra.mxu0 %v1394_v25  ;;  %2904 = vmatmul.mubr.msk.f32.vlgmr.msra.gmra.mrb[72].mxu1 %vm1407_vm9, %v3739_v31 }
 0x217   : > { %2895 = vmatmul.mubr.msk.f32.vlgmr.msra.gmra.mrb[72].mxu0 %vm1407_vm9, %v3739_v31  ;;  %1981 = vmatprep.mubr.f32.mxu1 %v4795_v63  ;;  %v4798_v31 = vld [vmem:[#allocation2_spill] sm:$0xff] }
 0x218   : > { %1862 = vmatprep.mubr.f32.mxu0 %v4795_v63  ;;  %2945 = vmatprep.subr.bf16.mxu0 %v2944_v6  ;;  %v4799_v0 = vpack.c.bf16 %v3160_v11, %v4798_v31  ;;  %v2366_v11 = vld [vmem:[%s4787_s6] sm:$0xff] }
 0x219   : > { %2947 = vmatpush1.bf16.msra.mxu0 %v4797_v32  ;;  %2941 = vmatprep.subr.bf16.mxu1 %v2940_v62 }
 0x21a   : > { %2905 = vmatmul.mubr.msk.f32.gmra.mrb[74].mxu1 %vm1407_vm9, %v3775_v20  ;;  %2953 = vmatprep.subr.bf16.mxu0 %v2952_v29 }
 0x21b   : > { %2896 = vmatmul.mubr.msk.f32.gmra.mrb[74].mxu0 %vm1407_vm9, %v3775_v20  ;;  %1987 = vmatprep.mubr.f32.mxu1 %v4795_v63  ;;  %v2950_v20 = vpack.c.bf16 %v3061_v17, %v3060_v16 }
 0x21c   : > { %1868 = vmatprep.mubr.f32.mxu0 %v4795_v63  ;;  %2943 = vmatpush1.bf16.msra.mxu1 %v4799_v0 }
 0x21d   : > { %2949 = vmatprep.subr.bf16.mxu1 %v2948_v55 }
 0x21e   : > { %2906 = vmatmul.mubr.msk.f32.gmra.mrb[76].mxu1 %vm1407_vm9, %v3799_v4 }
 0x21f   : > { %2897 = vmatmul.mubr.msk.f32.gmra.mrb[76].mxu0 %vm1407_vm9, %v3799_v4  ;;  %1993 = vmatprep.mubr.f32.mxu1 %v4795_v63  ;;  %v3062_v4 = vld [vmem:[%s3150_s12 + $0x30] sm:$0xff] }
 0x220   : > { %1874 = vmatprep.mubr.f32.mxu0 %v4795_v63 }
 0x222   : > { %2907 = vmatmul.mubr.msk.f32.gmra.mrb[78].mxu1 %vm1407_vm9, %v3826_v34 }
 0x223   : > { %2898 = vmatmul.mubr.msk.f32.gmra.mrb[78].mxu0 %vm1407_vm9, %v3826_v34  ;;  %1999 = vmatprep.mubr.f32.mxu1 %v4795_v63  ;;  %v3063_v34 = vld [vmem:[%s3150_s12 + $0x80] sm:$0xff] }
 0x224   : > { %1880 = vmatprep.mubr.f32.mxu0 %v4795_v63 }
 0x226   : > { %2908 = vmatmul.mubr.msk.f32.gmra.mrb[80].mxu1 %vm1407_vm9, %v3854_v47 }
 0x227   : > { %2899 = vmatmul.mubr.msk.f32.gmra.mrb[80].mxu0 %vm1407_vm9, %v3854_v47  ;;  %2005 = vmatprep.mubr.f32.mxu1 %v4795_v63  ;;  %v2954_v47 = vpack.c.bf16 %v3063_v34, %v3062_v4 }
 0x228   : > { %1886 = vmatprep.mubr.f32.mxu0 %v4795_v63 }
 0x22a   : > { %2909 = vmatmul.mubr.msk.f32.gmra.mrb[82].mxu1 %vm1407_vm9, %v3875_v24 }
 0x22b   : > { %2900 = vmatmul.mubr.msk.f32.gmra.mrb[82].mxu0 %vm1407_vm9, %v3875_v24  ;;  %2011 = vmatprep.mubr.f32.mxu1 %v4795_v63  ;;  %v3064_v24 = vld [vmem:[%s3150_s12 + $0x48] sm:$0xff] }
 0x22c   : > { %1892 = vmatprep.mubr.f32.mxu0 %v4795_v63 }
 0x22e   : > { %2910 = vmatmul.mubr.msk.f32.gmra.mrb[84].mxu1 %vm1407_vm9, %v3891_v54 }
 0x22f   : > { %2901 = vmatmul.mubr.msk.f32.gmra.mrb[84].mxu0 %vm1407_vm9, %v3891_v54  ;;  %2017 = vmatprep.mubr.f32.mxu1 %v4795_v63  ;;  %v3065_v54 = vld [vmem:[%s3150_s12 + $0x98] sm:$0xff] }
 0x230   : > { %1898 = vmatprep.mubr.f32.mxu0 %v4795_v63 }
 0x232   : > { %2911 = vmatmul.mubr.msk.f32.gmra.mrb[86].mxu1 %vm1407_vm9, %v3902_v43 }
 0x233   : > { %2902 = vmatmul.mubr.msk.f32.gmra.mrb[86].mxu0 %vm1407_vm9, %v3902_v43  ;;  %2023 = vmatprep.mubr.f32.mxu1 %v4795_v63  ;;  %v2956_v43 = vpack.c.bf16 %v3065_v54, %v3064_v24 }
 0x234   : > { %1904 = vmatprep.mubr.f32.mxu0 %v4795_v63 }
 0x236   : > { %2912 = vmatmul.mubr.msk.f32.gmra.mrb[88].mxu1 %vm1407_vm9, %v3913_v18 }
 0x237   : > { %2903 = vmatmul.mubr.msk.f32.gmra.mrb[88].mxu0 %vm1407_vm9, %v3913_v18  ;;  %2434 = vmatprep.mubr.f32.mxu1 %v4795_v63  ;;  %v3066_v18 = vld [vmem:[%s3150_s12 + $0x40] sm:$0xff] }
 0x238   : > { %2505 = vmatprep.mubr.f32.mxu0 %v4795_v63  ;;  %v2958_v36 = vpack.c.bf16 %v3067_v50, %v3066_v18 }
 0x23a   : > { %2913 = vmatmul.mubr.msk.f32.vlgmr.msra.gmra.mrb[44].mxu1 %vm357_vm0, %v2366_v11 }
 0x23b   : > { %2914 = vmatmul.mubr.msk.f32.vlgmr.msra.gmra.mrb[62].mxu0 %vm357_vm0, %v2366_v11  ;;  %2951 = vmatpush1.bf16.msra.mxu1 %v2950_v20 }
 0x23c   : > { %2955 = vmatpush1.bf16.msra.mxu0 %v2954_v47  ;;  %2647 = vmatprep.mubr.f32.mxu0 %v4795_v63 }
 0x23d   : > { %2576 = vmatprep.mubr.f32.mxu1 %v4795_v63  ;;  %2957 = vmatprep.subr.bf16.mxu1 %v2956_v43 }
 0x23e   : > { %2915 = vmatmul.mubr.msk.f32.vlgmr.msra.gmra.mrb[62].mxu1 %vm357_vm0, %v2366_v11 }
 0x23f   : > { %2916 = vmatmul.mubr.msk.f32.vlgmr.msra.gmra.mrb[80].mxu0 %vm357_vm0, %v2366_v11  ;;  %2959 = vmatpush1.bf16.msra.mxu1 %v2958_v36 }
 0x240   : > { %2718 = vmatprep.mubr.f32.mxu1 %v4795_v63 }
 0x242   : > { %2917 = vmatmul.mubr.msk.f32.vlgmr.msra.gmra.mrb[80].mxu1 %vm357_vm0, %v2366_v11 }
 0x29f   : > { %v1501_v42 = vpop.f32.mrb[36].mxu1 }
 0x2a0   : > { %v1503_v21 = vpop.f32.mrb[37].mxu1 }
 0x2a3   : > { %v1507_v13 = vpop.f32.mrb[38].mxu1 }
 0x2a4   : > { %v1509_v23 = vpop.f32.mrb[39].mxu1 }
 0x2a7   : > { %v1513_v10 = vpop.f32.mrb[40].mxu1 }
 0x2a8   : > { %v1515_v38 = vpop.f32.mrb[41].mxu1 }
 0x2ab   : > { %v4166_v57 = vpop.f32.mrb[42].mxu1 }
 0x2ac   : > { %v4168_v61 = vpop.f32.mrb[43].mxu1 }
 0x2b3   : > { %v4170_v19 = vpop.f32.mrb[46].mxu1 }
 0x2b4   : > { %v4172_v26 = vpop.f32.mrb[47].mxu1 }
 0x2b6   : > { %v1620_v46 = vpop.f32.mrb[54].mxu0 }
 0x2b7   : > { %v1622_v5 = vpop.f32.mrb[55].mxu0  ;;  %2034 = vrot.lane.b32.xlu1 %v1620_v46, %s3078_s11  ;;  %v4175_v63 = vpop.f32.mrb[48].mxu1 }
 0x2b8   : > { %2036 = vrot.lane.b32.xlu0 %v1622_v5, %s3078_s11  ;;  %v4178_v15 = vpop.f32.mrb[49].mxu1 }
 0x2ba   : > { %v1626_v3 = vpop.f32.mrb[56].mxu0 }
 0x2bb   : > { %v1628_v2 = vpop.f32.mrb[57].mxu0  ;;  %2064 = vrot.lane.b32.xlu1 %v1626_v3, %s3079_s13  ;;  %v4181_v39 = vpop.f32.mrb[50].mxu1 }
 0x2bc   : > { %2066 = vrot.lane.b32.xlu0 %v1628_v2, %s3079_s13  ;;  %v4184_v49 = vpop.f32.mrb[51].mxu1 }
 0x2be   : > { %v1632_v33 = vpop.f32.mrb[58].mxu0 }
 0x2bf   : > { %v1634_v9 = vpop.f32.mrb[59].mxu0  ;;  %2104 = vrot.lane.b32.xlu1 %v1632_v33, %s3080_s14  ;;  %v4187_v56 = vpop.f32.mrb[52].mxu1 }
 0x2c0   : > { %2106 = vrot.lane.b32.xlu0 %v1634_v9, %s3080_s14  ;;  %v4190_v59 = vpop.f32.mrb[53].mxu1 }
 0x2c2   : > { %v1638_v48 = vpop.f32.mrb[60].mxu0 }
 0x2c3   : > { %v1640_v60 = vpop.f32.mrb[61].mxu0  ;;  %2144 = vrot.lane.b32.xlu1 %v1638_v48, %s3081_s15  ;;  %v4193_v30 = vpop.f32.mrb[54].mxu1 }
 0x2c4   : > { %2146 = vrot.lane.b32.xlu0 %v1640_v60, %s3081_s15  ;;  %v4196_v28 = vpop.f32.mrb[55].mxu1 }
 0x2c7   : > { %v4198_v22 = vpop.f32.mrb[56].mxu1 }
 0x2c8   : > { %v4200_v35 = vpop.f32.mrb[57].mxu1 }
 0x2ca   : > { %v1650_v1 = vpop.f32.mrb[64].mxu0 }
 0x2cb   : > { %v1652_v7 = vpop.f32.mrb[65].mxu0  ;;  %2194 = vrot.lane.b32.xlu1 %v1650_v1, %s3082_s16  ;;  %v4203_v40 = vpop.f32.mrb[58].mxu1 }
 0x2cc   : > { %2196 = vrot.lane.b32.xlu0 %v1652_v7, %s3082_s16  ;;  %v4206_v27 = vpop.f32.mrb[59].mxu1 }
 0x2ce   : > { %v1656_v53 = vpop.f32.mrb[66].mxu0 }
 0x2cf   : > { %v1658_v51 = vpop.f32.mrb[67].mxu0  ;;  %2234 = vrot.lane.b32.xlu1 %v1656_v53, %s3083_s17  ;;  %v4209_v25 = vpop.f32.mrb[60].mxu1 }
 0x2d0   : > { %2236 = vrot.lane.b32.xlu0 %v1658_v51, %s3083_s17  ;;  %v4212_v44 = vpop.f32.mrb[61].mxu1 }
 0x2d2   : > { %v1662_v45 = vpop.f32.mrb[68].mxu0 }
 0x2d3   : > { %2030 = vrot.lane.b32.xlu1 %v1501_v42, %s3078_s11  ;;  %v1664_v6 = vpop.f32.mrb[69].mxu0 }
 0x2d4   : > { %2032 = vrot.lane.b32.xlu0 %v1503_v21, %s3078_s11 }
 0x2d6   : > { %v1668_v12 = vpop.f32.mrb[70].mxu0 }
 0x2d7   : > { %2276 = vrot.lane.b32.xlu1 %v1664_v6, %s3084_s18  ;;  %v1670_v37 = vpop.f32.mrb[71].mxu0  ;;  %v4217_v62 = vpop.f32.mrb[64].mxu1 }
 0x2d8   : > { %2274 = vrot.lane.b32.xlu0 %v1662_v45, %s3084_s18  ;;  %v4220_v52 = vpop.f32.mrb[65].mxu1 }
 0x2db   : > { %2060 = vrot.lane.b32.xlu1 %v1507_v13, %s3079_s13  ;;  %v4223_v41 = vpop.f32.mrb[66].mxu1 }
 0x2dc   : > { %2062 = vrot.lane.b32.xlu0 %v1509_v23, %s3079_s13  ;;  %v4226_v29 = vpop.f32.mrb[67].mxu1 }
 0x2df   : > { %2316 = vrot.lane.b32.xlu1 %v1670_v37, %s3085_s19  ;;  %v4229_v32 = vpop.f32.mrb[68].mxu1 }
 0x2e0   : > { %2314 = vrot.lane.b32.xlu0 %v1668_v12, %s3085_s19  ;;  %v4232_v58 = vpop.f32.mrb[69].mxu1 }
 0x2e3   : > { %2100 = vrot.lane.b32.xlu1 %v1513_v10, %s3080_s14  ;;  %v4235_v14 = vpop.f32.mrb[70].mxu1 }
 0x2e4   : > { %2102 = vrot.lane.b32.xlu0 %v1515_v38, %s3080_s14  ;;  %v4238_v55 = vpop.f32.mrb[71].mxu1 }
 0x2e9   : > { %v4240_v31 = vpop.f32.mrb[72].mxu1 }
 0x2ea   : > { %v1858_v0 = vpop.f32.mrb[72].mxu0  ;;  %v4242_v11 = vpop.f32.mrb[73].mxu1 }
 0x2eb   : > { %2042 = vrot.lane.b32.xlu1 %v1858_v0, %s3078_s11  ;;  %v1860_v16 = vpop.f32.mrb[73].mxu0 }
 0x2ec   : > { %2044 = vrot.lane.b32.xlu0 %v1860_v16, %s3078_s11 }
 0x2ed   : > { %v4246_v17 = vpop.f32.mrb[74].mxu1 }
 0x2ee   : > { %v1864_v20 = vpop.f32.mrb[74].mxu0  ;;  %v4248_v4 = vpop.f32.mrb[75].mxu1 }
 0x2ef   : > { %2140 = vrot.lane.b32.xlu1 %v4166_v57, %s3081_s15  ;;  %v1866_v34 = vpop.f32.mrb[75].mxu0 }
 0x2f0   : > { %2142 = vrot.lane.b32.xlu0 %v4168_v61, %s3081_s15 }
 0x2f1   : > { %v4254_v47 = vpop.f32.mrb[76].mxu1 }
 0x2f2   : > { %v1870_v24 = vpop.f32.mrb[76].mxu0  ;;  %v4256_v54 = vpop.f32.mrb[77].mxu1 }
 0x2f3   : > { %2072 = vrot.lane.b32.xlu1 %v1864_v20, %s3079_s13  ;;  %v1872_v43 = vpop.f32.mrb[77].mxu0 }
 0x2f4   : > { %2074 = vrot.lane.b32.xlu0 %v1866_v34, %s3079_s13 }
 0x2f5   : > { %v4260_v18 = vpop.f32.mrb[78].mxu1 }
 0x2f6   : > { %v1876_v50 = vpop.f32.mrb[78].mxu0  ;;  %v4262_v36 = vpop.f32.mrb[79].mxu1 }
 0x2f7   : > { %2112 = vrot.lane.b32.xlu1 %v1870_v24, %s3080_s14  ;;  %v1878_v42 = vpop.f32.mrb[79].mxu0 }
 0x2f8   : > { %2114 = vrot.lane.b32.xlu0 %v1872_v43, %s3080_s14 }
 0x2fb   : > { %2190 = vrot.lane.b32.xlu1 %v4170_v19, %s3082_s16 }
 0x2fc   : > { %2192 = vrot.lane.b32.xlu0 %v4172_v26, %s3082_s16 }
 0x2fd   : > { %v4270_v21 = vpop.f32.mrb[82].mxu1 }
 0x2fe   : > { %v1888_v13 = vpop.f32.mrb[82].mxu0  ;;  %v4272_v23 = vpop.f32.mrb[83].mxu1 }
 0x2ff   : > { %2152 = vrot.lane.b32.xlu1 %v1876_v50, %s3081_s15  ;;  %v1890_v10 = vpop.f32.mrb[83].mxu0 }
 0x300   : > { %2154 = vrot.lane.b32.xlu0 %v1878_v42, %s3081_s15 }
 0x301   : > { %v4276_v38 = vpop.f32.mrb[84].mxu1 }
 0x302   : > { %v1894_v57 = vpop.f32.mrb[84].mxu0  ;;  %v4278_v61 = vpop.f32.mrb[85].mxu1 }
 0x303   : > { %2230 = vrot.lane.b32.xlu1 %v4175_v63, %s3083_s17  ;;  %v1896_v19 = vpop.f32.mrb[85].mxu0 }
 0x304   : > { %2232 = vrot.lane.b32.xlu0 %v4178_v15, %s3083_s17 }
 0x305   : > { %v4284_v26 = vpop.f32.mrb[86].mxu1 }
 0x306   : > { %v1900_v46 = vpop.f32.mrb[86].mxu0  ;;  %v4286_v5 = vpop.f32.mrb[87].mxu1 }
 0x307   : > { %2272 = vrot.lane.b32.xlu1 %v4184_v49, %s3084_s18  ;;  %v1902_v3 = vpop.f32.mrb[87].mxu0 }
 0x308   : > { %2270 = vrot.lane.b32.xlu0 %v4181_v39, %s3084_s18 }
 0x309   : > { %v4292_v2 = vpop.f32.mrb[88].mxu1 }
 0x30a   : > { %v1906_v33 = vpop.f32.mrb[88].mxu0  ;;  %v4294_v63 = vpop.f32.mrb[89].mxu1 }
 0x30b   : > { %2202 = vrot.lane.b32.xlu1 %v1888_v13, %s3082_s16  ;;  %v1908_v15 = vpop.f32.mrb[89].mxu0 }
 0x30c   : > { %2204 = vrot.lane.b32.xlu0 %v1890_v10, %s3082_s16 }
 0x30d   : > { %v4298_v9 = vpop.f32.mrb[44].mxu1 }
 0x30e   : > { %v4300_v48 = vpop.f32.mrb[62].mxu0  ;;  %v4302_v60 = vpop.f32.mrb[45].mxu1 }
 0x30f   : > { %2312 = vrot.lane.b32.xlu1 %v4190_v59, %s3085_s19  ;;  %v4306_v39 = vpop.f32.mrb[63].mxu0 }
 0x310   : > { %2310 = vrot.lane.b32.xlu0 %v4187_v56, %s3085_s19  ;;  %v4336_v56 = vpop.permute.xlu1 %2353 }
 0x311   : > { %v4310_v49 = vpop.f32.mrb[62].mxu1 }
 0x312   : > { %v4312_v1 = vpop.f32.mrb[80].mxu0  ;;  %v4314_v7 = vpop.f32.mrb[63].mxu1 }
 0x313   : > { %2242 = vrot.lane.b32.xlu1 %v1894_v57, %s3083_s17  ;;  %v4317_v53 = vpop.f32.mrb[81].mxu0 }
 0x314   : > { %2244 = vrot.lane.b32.xlu0 %v1896_v19, %s3083_s17 }
 0x315   : > { %v4320_v51 = vpop.f32.mrb[80].mxu1 }
 0x316   : > { %4800 = vst [vmem:[#allocation2_spill] sm:$0xff] %v4320_v51  ;;  %v4322_v59 = vpop.f32.mrb[81].mxu1 }
 0x317   : > { %4801 = vst [vmem:[#allocation3_spill] sm:$0xff] %v4322_v59  ;;  %2038 = vrot.lane.b32.xlu1 %v4193_v30, %s3078_s11 }
 0x318   : > { %2040 = vrot.lane.b32.xlu0 %v4196_v28, %s3078_s11 }
 0x31b   : > { %2284 = vrot.lane.b32.xlu1 %v1902_v3, %s3084_s18 }
 0x31c   : > { %2282 = vrot.lane.b32.xlu0 %v1900_v46, %s3084_s18 }
 0x31f   : > { %2068 = vrot.lane.b32.xlu1 %v4198_v22, %s3079_s13 }
 0x320   : > { %2070 = vrot.lane.b32.xlu0 %v4200_v35, %s3079_s13 }
 0x323   : > { %2324 = vrot.lane.b32.xlu1 %v1908_v15, %s3085_s19 }
 0x324   : > { %2322 = vrot.lane.b32.xlu0 %v1906_v33, %s3085_s19 }
 0x327   : > { %2108 = vrot.lane.b32.xlu1 %v4203_v40, %s3080_s14 }
 0x328   : > { %2110 = vrot.lane.b32.xlu0 %v4206_v27, %s3080_s14 }
 0x329   : > { %v2035_v30 = vpop.permute.xlu1 %2034 }
 0x32a   : > { %v4342_v28 = vpop.permute.xlu0 %2036 }
 0x32b   : > { %2148 = vrot.lane.b32.xlu1 %v4209_v25, %s3081_s15  ;;  %v2056_v22 = vsel %vm1002_vm2, %v2035_v30, %v4342_v28 }
 0x32c   : > { %2150 = vrot.lane.b32.xlu0 %v4212_v44, %s3081_s15 }
 0x32d   : > { %v2065_v35 = vpop.permute.xlu1 %2064 }
 0x32e   : > { %v4351_v45 = vpop.permute.xlu0 %2066 }
 0x32f   : > { %2198 = vrot.lane.b32.xlu1 %v4217_v62, %s3082_s16  ;;  %v2086_v40 = vsel %vm1033_vm1, %v2065_v35, %v4351_v45 }
 0x330   : > { %2200 = vrot.lane.b32.xlu0 %v4220_v52, %s3082_s16  ;;  %v2093_v27 = vadd.f32 %v2086_v40, %v2056_v22 }
 0x331   : > { %v2105_v25 = vpop.permute.xlu1 %2104 }
 0x332   : > { %v4360_v44 = vpop.permute.xlu0 %2106 }
 0x333   : > { %2238 = vrot.lane.b32.xlu1 %v4223_v41, %s3083_s17  ;;  %v2126_v6 = vsel %vm1074_vm3, %v2105_v25, %v4360_v44 }
 0x334   : > { %2240 = vrot.lane.b32.xlu0 %v4226_v29, %s3083_s17  ;;  %v2133_v12 = vadd.f32 %v2126_v6, %v2093_v27 }
 0x335   : > { %v2145_v37 = vpop.permute.xlu1 %2144 }
 0x336   : > { %v4369_v62 = vpop.permute.xlu0 %2146 }
 0x337   : > { %2280 = vrot.lane.b32.xlu1 %v4232_v58, %s3084_s18  ;;  %v2166_v52 = vsel %vm1115_vm4, %v2145_v37, %v4369_v62 }
 0x338   : > { %2278 = vrot.lane.b32.xlu0 %v4229_v32, %s3084_s18  ;;  %v4378_v41 = vadd.f32 %v2166_v52, %v2133_v12 }
 0x33b   : > { %2320 = vrot.lane.b32.xlu1 %v4238_v55, %s3085_s19 }
 0x33c   : > { %2318 = vrot.lane.b32.xlu0 %v4235_v14, %s3085_s19 }
 0x33d   : > { %v4384_v29 = vpop.permute.xlu1 %2194 }
 0x33e   : > { %v4386_v0 = vpop.permute.xlu0 %2196 }
 0x33f   : > { %2046 = vrot.lane.b32.xlu1 %v4240_v31, %s3078_s11 }
 0x340   : > { %2048 = vrot.lane.b32.xlu0 %v4242_v11, %s3078_s11 }
 0x341   : > { %v4392_v58 = vpop.permute.xlu1 %2234 }
 0x342   : > { %v4394_v32 = vpop.permute.xlu0 %2236 }
 0x343   : > { %2076 = vrot.lane.b32.xlu1 %v4246_v17, %s3079_s13 }
 0x344   : > { %2078 = vrot.lane.b32.xlu0 %v4248_v4, %s3079_s13  ;;  %s3031_s13 = smul.u32 80, %s4809_s28 }
 0x345   : > { %v4400_v14 = vpop.permute.xlu1 %2030 }
 0x346   : > { %v2033_v55 = vpop.permute.xlu0 %2032 }
 0x347   : > { %v2057_v16 = vsel %vm1002_vm2, %v2033_v55, %v2035_v30  ;;  %2116 = vrot.lane.b32.xlu1 %v4254_v47, %s3080_s14  ;;  %v2058_v4 = vsel %vm1002_vm2, %v4400_v14, %v2033_v55  ;;  %v2256_v30 = vsel %vm1207_vm6, %v4392_v58, %v4394_v32 }
 0x348   : > { %2118 = vrot.lane.b32.xlu0 %v4256_v54, %s3080_s14 }
 0x349   : > { %v4408_v31 = vpop.permute.xlu1 %2276 }
 0x34a   : > { %v4410_v11 = vpop.permute.xlu0 %2274 }
 0x34b   : > { %2156 = vrot.lane.b32.xlu1 %v4260_v18, %s3081_s15 }
 0x34c   : > { %2158 = vrot.lane.b32.xlu0 %v4262_v36, %s3081_s15 }
 0x34d   : > { %v4416_v17 = vpop.permute.xlu1 %2060 }
 0x34e   : > { %v2063_v20 = vpop.permute.xlu0 %2062 }
 0x34f   : > { %v2087_v34 = vsel %vm1033_vm1, %v2063_v20, %v2065_v35  ;;  %2206 = vrot.lane.b32.xlu1 %v4270_v21, %s3082_s16  ;;  %v2088_v47 = vsel %vm1033_vm1, %v4416_v17, %v2063_v20 }
 0x350   : > { %v2092_v24 = vadd.f32 %v2087_v34, %v2057_v16  ;;  %2208 = vrot.lane.b32.xlu0 %v4272_v23, %s3082_s16  ;;  %v2091_v54 = vadd.f32 %v2088_v47, %v2058_v4  ;;  %s305_s16 = scalar_lea.vmem %s4789_s8, %s3031_s13 }
 0x351   : > { %v4430_v43 = vpop.permute.xlu1 %2316 }
 0x352   : > { %v2315_v18 = vpop.permute.xlu0 %2314 }
 0x353   : > { %2246 = vrot.lane.b32.xlu1 %v4276_v38, %s3083_s17  ;;  %v2735_v38 = vld [vmem:[%s4788_s7] sm:$0xff]  ;;  %v2336_v52 = vsel %vm1289_vm8, %v2315_v18, %v4430_v43 }
 0x354   : > { %2248 = vrot.lane.b32.xlu0 %v4278_v61, %s3083_s17 }
 0x355   : > { %v4436_v50 = vpop.permute.xlu1 %2100 }
 0x356   : > { %v2103_v36 = vpop.permute.xlu0 %2102 }
 0x357   : > { %v2127_v42 = vsel %vm1074_vm3, %v2103_v36, %v2105_v25  ;;  %2288 = vrot.lane.b32.xlu1 %v4286_v5, %s3084_s18  ;;  %v2128_v21 = vsel %vm1074_vm3, %v4436_v50, %v2103_v36  ;;  %v2296_v25 = vsel %vm1248_vm7, %v4410_v11, %v4408_v31 }
 0x358   : > { %v2132_v13 = vadd.f32 %v2127_v42, %v2092_v24  ;;  %2286 = vrot.lane.b32.xlu0 %v4284_v26, %s3084_s18  ;;  %v2131_v23 = vadd.f32 %v2128_v21, %v2091_v54 }
 0x35b   : > { %2328 = vrot.lane.b32.xlu1 %v4294_v63, %s3085_s19 }
 0x35c   : > { %2326 = vrot.lane.b32.xlu0 %v4292_v2, %s3085_s19  ;;  %v2216_v2 = vsel %vm1166_vm5, %v4384_v29, %v4386_v0 }
 0x35d   : > { %v4451_v10 = vpop.permute.xlu1 %2042 }
 0x35e   : > { %v4456_v57 = vpop.permute.xlu0 %2044 }
 0x35f   : > { %v2052_v22 = vsel %vm1002_vm2, %v4451_v10, %v4456_v57 }
 0x360   : > { %2738 = vperm.xlu0 %3051, %v2735_v38  }
 0x361   : > { %v4458_v61 = vpop.permute.xlu1 %2140 }
 0x362   : > { %v2143_v19 = vpop.permute.xlu0 %2142 }
 0x363   : > { %v2167_v26 = vsel %vm1115_vm4, %v2143_v19, %v2145_v37  ;;  %v2168_v46 = vsel %vm1115_vm4, %v4458_v61, %v2143_v19 }
 0x364   : > { %v2171_v5 = vadd.f32 %v2168_v46, %v2131_v23  ;;  %v2172_v3 = vadd.f32 %v2167_v26, %v2132_v13 }
 0x365   : > { %v2073_v33 = vpop.permute.xlu1 %2072 }
 0x366   : > { %v2972_v63 = vadd.f32 %v2216_v2, %v2172_v3  ;;  %v4469_v15 = vpop.permute.xlu0 %2074 }
 0x367   : > { %v2082_v35 = vsel %vm1033_vm1, %v2073_v33, %v4469_v15 }
 0x368   : > { %v2973_v40 = vadd.f32 %v2972_v63, %v2256_v30  ;;  %v2097_v27 = vadd.f32 %v2082_v35, %v2052_v22 }
 0x369   : > { %v2113_v6 = vpop.permute.xlu1 %2112 }
 0x36a   : > { %v2974_v12 = vadd.f32 %v2973_v40, %v2296_v25  ;;  %v4486_v37 = vpop.permute.xlu0 %2114 }
 0x36b   : > { %v2122_v55 = vsel %vm1074_vm3, %v2113_v6, %v4486_v37 }
 0x36c   : > { %v2975_v16 = vadd.f32 %v2974_v12, %v2336_v52  ;;  %v2137_v20 = vadd.f32 %v2122_v55, %v2097_v27 }
 0x36d   : > { %v4494_v4 = vpop.permute.xlu1 %2190 }
 0x36e   : > { %v2976_v34 = vadd.f32 %v2975_v16, %v4336_v56  ;;  %v4497_v47 = vpop.permute.xlu0 %2192 }
 0x36f   : > { %v2217_v24 = vsel %vm1166_vm5, %v4497_v47, %v4384_v29 }
 0x370   : > { %v4504_v54 = vadd.f32 %v2976_v34, %v4300_v48  ;;  %v2966_v36 = vadd.f32 %v2217_v24, %v2171_v5 }
 0x371   : > { %v2153_v42 = vpop.permute.xlu1 %2152 }
 0x372   : > { %4802 = vst [vmem:[#allocation4_spill] sm:$0xff] %v4504_v54  ;;  %v4506_v21 = vpop.permute.xlu0 %2154 }
 0x373   : > { %v2162_v13 = vsel %vm1115_vm4, %v2153_v42, %v4506_v21 }
 0x374   : > { %v4511_v23 = vadd.f32 %v2162_v13, %v2137_v20 }
 0x375   : > { %v4513_v38 = vpop.permute.xlu1 %2230 }
 0x376   : > { %v4515_v19 = vpop.permute.xlu0 %2232 }
 0x377   : > { %v2257_v48 = vsel %vm1207_vm6, %v4515_v19, %v4392_v58 }
 0x378   : > { %v2967_v29 = vadd.f32 %v2966_v36, %v2257_v48 }
 0x379   : > { %v4521_v26 = vpop.permute.xlu1 %2272 }
 0x37a   : > { %v2297_v46 = vsel %vm1248_vm7, %v4521_v26, %v4410_v11  ;;  %v4527_v5 = vpop.permute.xlu0 %2270 }
 0x37b   : > { %v2968_v3 = vadd.f32 %v2967_v29, %v2297_v46 }
 0x37d   : > { %v2203_v2 = vpop.permute.xlu1 %2202 }
 0x37e   : > { %v4529_v63 = vpop.permute.xlu0 %2204 }
 0x381   : > { %v4531_v30 = vpop.permute.xlu1 %2312 }
 0x382   : > { %v2337_v58 = vsel %vm1289_vm8, %v4531_v30, %v2315_v18  ;;  %v4536_v22 = vpop.permute.xlu0 %2310 }
 0x383   : > { %v2969_v35 = vadd.f32 %v2968_v3, %v2337_v58 }
 0x385   : > { %v2970_v40 = vadd.f32 %v2969_v35, %v4336_v56  ;;  %v2243_v27 = vpop.permute.xlu1 %2242 }
 0x386   : > { %v4539_v25 = vpop.permute.xlu0 %2244 }
 0x387   : > { %v4542_v11 = vadd.f32 %v2970_v40, %v4302_v60  ;;  %v2252_v12 = vsel %vm1207_vm6, %v2243_v27, %v4539_v25 }
 0x389   : > { %4803 = vst [vmem:[#allocation5_spill] sm:$0xff] %v4542_v11  ;;  %v4547_v52 = vpop.permute.xlu1 %2038 }
 0x38a   : > { %v2041_v55 = vpop.permute.xlu0 %2040 }
 0x38b   : > { %v2053_v24 = vsel %vm1002_vm2, %v2041_v55, %v4451_v10 }
 0x38d   : > { %v4549_v16 = vpop.permute.xlu1 %2284 }
 0x38e   : > { %v2283_v18 = vpop.permute.xlu0 %2282 }
 0x391   : > { %v4551_v20 = vpop.permute.xlu1 %2068 }
 0x392   : > { %v2071_v34 = vpop.permute.xlu0 %2070 }
 0x393   : > { %v2083_v60 = vsel %vm1033_vm1, %v2071_v34, %v2073_v33  ;;  %v2084_v35 = vsel %vm1033_vm1, %v4551_v20, %v2071_v34  ;;  %v2054_v33 = vsel %vm1002_vm2, %v4547_v52, %v2041_v55  ;;  %v2212_v34 = vsel %vm1166_vm5, %v2203_v2, %v4529_v63 }
 0x394   : > { %v2096_v36 = vadd.f32 %v2083_v60, %v2053_v24 }
 0x395   : > { %v4558_v13 = vpop.permute.xlu1 %2324 }
 0x396   : > { %v2323_v48 = vpop.permute.xlu0 %2322 }
 0x399   : > { %v4560_v29 = vpop.permute.xlu1 %2108 }
 0x39a   : > { %v2111_v46 = vpop.permute.xlu0 %2110 }
 0x39b   : > { %v2123_v3 = vsel %vm1074_vm3, %v2111_v46, %v2113_v6  ;;  %v2124_v24 = vsel %vm1074_vm3, %v4560_v29, %v2111_v46  ;;  %v2095_v6 = vadd.f32 %v2084_v35, %v2054_v33  ;;  %v2292_v35 = vsel %vm1248_vm7, %v2283_v18, %v4549_v16 }
 0x39c   : > { %v2136_v58 = vadd.f32 %v2123_v3, %v2096_v36 }
 0x39d   : > { %v4567_v40 = vpop.permute.xlu1 %2148  ;;  %v2135_v55 = vadd.f32 %v2124_v24, %v2095_v6  ;;  %v2332_v24 = vsel %vm1289_vm8, %v2323_v48, %v4558_v13 }
 0x39e   : > { %v2151_v10 = vpop.permute.xlu0 %2150 }
 0x39f   : > { %v2163_v60 = vsel %vm1115_vm4, %v2151_v10, %v2153_v42  ;;  %v2164_v3 = vsel %vm1115_vm4, %v4567_v40, %v2151_v10 }
 0x3a0   : > { %v2176_v36 = vadd.f32 %v2163_v60, %v2136_v58  ;;  %v2175_v46 = vadd.f32 %v2164_v3, %v2135_v55 }
 0x3a1   : > { %v4583_v54 = vpop.permute.xlu1 %2198 }
 0x3a2   : > { %v2996_v11 = vadd.f32 %v2212_v34, %v2176_v36  ;;  %v4585_v51 = vpop.permute.xlu0 %2200 }
 0x3a3   : > { %v2213_v42 = vsel %vm1166_vm5, %v4585_v51, %v2203_v2  ;;  %v2215_v2 = vsel %vm1166_vm5, %v4386_v0, %v4583_v54 }
 0x3a4   : > { %v2997_v58 = vadd.f32 %v2996_v11, %v2252_v12  ;;  %v2990_v10 = vadd.f32 %v2213_v42, %v2175_v46  ;;  %v2978_v55 = vadd.f32 %v2215_v2, %v4378_v41 }
 0x3a5   : > { %v4593_v33 = vpop.permute.xlu1 %2238 }
 0x3a6   : > { %v2998_v60 = vadd.f32 %v2997_v58, %v2292_v35  ;;  %v4595_v59 = vpop.permute.xlu0 %2240  ;;  %v2255_v36 = vsel %vm1207_vm6, %v4394_v32, %v4593_v33 }
 0x3a7   : > { %v2253_v11 = vsel %vm1207_vm6, %v4595_v59, %v2243_v27  ;;  %v2979_v32 = vadd.f32 %v2978_v55, %v2255_v36 }
 0x3a8   : > { %v2999_v12 = vadd.f32 %v2998_v60, %v2332_v24  ;;  %v2991_v6 = vadd.f32 %v2990_v10, %v2253_v11 }
 0x3a9   : > { %v4611_v34 = vpop.permute.xlu1 %2280 }
 0x3aa   : > { %v3000_v3 = vadd.f32 %v2999_v12, %v4336_v56  ;;  %v2293_v0 = vsel %vm1248_vm7, %v4611_v34, %v2283_v18  ;;  %v4618_v42 = vpop.permute.xlu0 %2278 }
 0x3ab   : > { %v2295_v27 = vsel %vm1248_vm7, %v4408_v31, %v4618_v42  ;;  %v2992_v58 = vadd.f32 %v2991_v6, %v2293_v0 }
 0x3ac   : > { %v4625_v46 = vadd.f32 %v3000_v3, %v4312_v1  ;;  %v2980_v60 = vadd.f32 %v2979_v32, %v2295_v27 }
 0x3ad   : > { %v4627_v35 = vpop.permute.xlu1 %2320 }
 0x3ae   : > { %v2333_v41 = vsel %vm1289_vm8, %v4627_v35, %v2323_v48  ;;  %v4632_v18 = vpop.permute.xlu0 %2318 }
 0x3af   : > { %v2993_v10 = vadd.f32 %v2992_v58, %v2333_v41  ;;  %v2335_v31 = vsel %vm1289_vm8, %v4430_v43, %v4632_v18 }
 0x3b0   : > { %v2981_v24 = vadd.f32 %v2980_v60, %v2335_v31 }
 0x3b1   : > { %v2994_v1 = vadd.f32 %v2993_v10, %v4336_v56  ;;  %v2047_v2 = vpop.permute.xlu1 %2046 }
 0x3b2   : > { %v2982_v11 = vadd.f32 %v2981_v24, %v4336_v56  ;;  %v2049_v12 = vpop.permute.xlu0 %2048 }
 0x3b3   : > { %v4641_v6 = vadd.f32 %v2994_v1, %v4314_v7  ;;  %v2059_v27 = vsel %vm1002_vm2, %v2049_v12, %v4400_v14  ;;  %v2258_v1 = vsel %vm1207_vm6, %v4513_v38, %v4515_v19  ;;  %v2338_v19 = vsel %vm1289_vm8, %v4536_v22, %v4531_v30 }
 0x3b4   : > { %v4644_v48 = vadd.f32 %v2982_v11, %v4306_v39  ;;  %v2055_v30 = vsel %vm1002_vm2, %v4342_v28, %v4547_v52 }
 0x3b5   : > { %v2077_v36 = vpop.permute.xlu1 %2076 }
 0x3b6   : > { %v2079_v3 = vpop.permute.xlu0 %2078 }
 0x3b7   : > { %v2089_v55 = vsel %vm1033_vm1, %v2079_v3, %v4416_v17  ;;  %v2218_v17 = vsel %vm1166_vm5, %v4494_v4, %v4497_v47 }
 0x3b8   : > { %v2090_v32 = vadd.f32 %v2089_v55, %v2059_v27  ;;  %v2080_v27 = vsel %vm1033_vm1, %v2077_v36, %v2079_v3  ;;  %v2050_v3 = vsel %vm1002_vm2, %v2047_v2, %v2049_v12  ;;  %v2051_v12 = vsel %vm1002_vm2, %v4456_v57, %v2047_v2 }
 0x3b9   : > { %v2117_v43 = vpop.permute.xlu1 %2116  ;;  %v2165_v57 = vsel %vm1115_vm4, %v4369_v62, %v4567_v40 }
 0x3ba   : > { %v2119_v0 = vpop.permute.xlu0 %2118 }
 0x3bb   : > { %v2129_v7 = vsel %vm1074_vm3, %v2119_v0, %v4436_v50 }
 0x3bc   : > { %v2130_v39 = vadd.f32 %v2129_v7, %v2090_v32 }
 0x3bd   : > { %v2157_v58 = vpop.permute.xlu1 %2156 }
 0x3be   : > { %v2159_v60 = vpop.permute.xlu0 %2158 }
 0x3bf   : > { %v2169_v41 = vsel %vm1115_vm4, %v2159_v60, %v4458_v61  ;;  %v2298_v61 = vsel %vm1248_vm7, %v4527_v5, %v4521_v26 }
 0x3c0   : > { %v2170_v10 = vadd.f32 %v2169_v41, %v2130_v39  ;;  %v2081_v39 = vsel %vm1033_vm1, %v4469_v15, %v2077_v36  ;;  %v2121_v15 = vsel %vm1074_vm3, %v4486_v37, %v2117_v43  ;;  %v2160_v36 = vsel %vm1115_vm4, %v2157_v58, %v2159_v60 }
 0x3c1   : > { %v2207_v31 = vpop.permute.xlu1 %2206  ;;  %v2161_v37 = vsel %vm1115_vm4, %v4506_v21, %v2157_v58 }
 0x3c2   : > { %v2960_v14 = vadd.f32 %v2218_v17, %v2170_v10  ;;  %v2211_v50 = vsel %vm1166_vm5, %v4529_v63, %v2207_v31  ;;  %v2209_v24 = vpop.permute.xlu0 %2208  ;;  %v2098_v10 = vadd.f32 %v2081_v39, %v2051_v12  ;;  %v4806_v12 = vld [vmem:[#allocation5_spill] sm:$0xff] }
 0x3c3   : > { %v3002_v47 = vadd.f32 %v2211_v50, %v4511_v23  ;;  %v2085_v23 = vsel %vm1033_vm1, %v4351_v45, %v4551_v20  ;;  %v2125_v45 = vsel %vm1074_vm3, %v4360_v44, %v4560_v29  ;;  %v2099_v20 = vadd.f32 %v2080_v27, %v2050_v3 }
 0x3c4   : > { %v2961_v11 = vadd.f32 %v2960_v14, %v2258_v1  ;;  %v2094_v52 = vadd.f32 %v2085_v23, %v2055_v30  ;;  %v2219_v2 = vsel %vm1166_vm5, %v2209_v24, %v4494_v4  ;;  %v2138_v60 = vadd.f32 %v2121_v15, %v2098_v10  ;;  %v4805_v30 = vld [vmem:[#allocation2_spill] sm:$0xff] }
 0x3c5   : > { %v2247_v55 = vpop.permute.xlu1 %2246  ;;  %v2210_v62 = vsel %vm1166_vm5, %v2207_v31, %v2209_v24  ;;  %v2294_v27 = vsel %vm1248_vm7, %v4618_v42, %v4611_v34 }
 0x3c6   : > { %v2962_v7 = vadd.f32 %v2961_v11, %v2298_v61  ;;  %v2251_v63 = vsel %vm1207_vm6, %v4539_v25, %v2247_v55  ;;  %v2249_v32 = vpop.permute.xlu0 %2248  ;;  %v2120_v25 = vsel %vm1074_vm3, %v2117_v43, %v2119_v0  ;;  %v2134_v43 = vadd.f32 %v2125_v45, %v2094_v52 }
 0x3c7   : > { %v3003_v26 = vadd.f32 %v3002_v47, %v2251_v63  ;;  %v2139_v17 = vadd.f32 %v2120_v25, %v2099_v20  ;;  %v2259_v21 = vsel %vm1207_vm6, %v2249_v32, %v4513_v38  ;;  %v2178_v1 = vadd.f32 %v2161_v37, %v2138_v60 }
 0x3c8   : > { %v2963_v41 = vadd.f32 %v2962_v7, %v2338_v19  ;;  %v2174_v58 = vadd.f32 %v2165_v57, %v2134_v43  ;;  %v2334_v63 = vsel %vm1289_vm8, %v4632_v18, %v4627_v35  ;;  %v4804_v18 = vld [vmem:[#allocation3_spill] sm:$0xff] }
 0x3c9   : > { %v2289_v14 = vpop.permute.xlu1 %2288  ;;  %v2179_v50 = vadd.f32 %v2160_v36, %v2139_v17  ;;  %v3008_v38 = vadd.f32 %v2210_v62, %v2178_v1  ;;  %v4807_v36 = vld [vmem:[#allocation4_spill] sm:$0xff] }
 0x3ca   : > { %v2964_v0 = vadd.f32 %v2963_v41, %v4336_v56  ;;  %v2287_v28 = vpop.permute.xlu0 %2286 }
 0x3cb   : > { %v2291_v44 = vsel %vm1248_vm7, %v4549_v16, %v2287_v28  ;;  %v2214_v16 = vsel %vm1166_vm5, %v4583_v54, %v4585_v51  ;;  %v3014_v4 = vadd.f32 %v2219_v2, %v2179_v50  ;;  %v2254_v51 = vsel %vm1207_vm6, %v4593_v33, %v4595_v59 }
 0x3cc   : > { %v2965_v29 = vadd.f32 %v2964_v0, %v4298_v9  ;;  %v3004_v9 = vadd.f32 %v3003_v26, %v2291_v44  ;;  %v2250_v54 = vsel %vm1207_vm6, %v2247_v55, %v2249_v32  ;;  %v2984_v24 = vadd.f32 %v2214_v16, %v2174_v58 }
 0x3cd   : > { %v3015_v61 = vadd.f32 %v3014_v4, %v2259_v21  ;;  %v2329_v47 = vpop.permute.xlu1 %2328  ;;  %v2290_v59 = vsel %vm1248_vm7, %v2287_v28, %v2289_v14  ;;  %v3009_v7 = vadd.f32 %v3008_v38, %v2250_v54 }
 0x3ce   : > { %v2327_v40 = vpop.permute.xlu0 %2326  ;;  %v2985_v55 = vadd.f32 %v2984_v24, %v2254_v51  ;;  %v2339_v34 = vsel %vm1289_vm8, %v2329_v47, %v4536_v22 }
 0x3cf   : > { %v2331_v11 = vsel %vm1289_vm8, %v4558_v13, %v2327_v40  ;;  %v2299_v13 = vsel %vm1248_vm7, %v2289_v14, %v4527_v5  ;;  %v2330_v5 = vsel %vm1289_vm8, %v2327_v40, %v2329_v47  ;;  %v3010_v23 = vadd.f32 %v3009_v7, %v2290_v59 }
 0x3d0   : > { %v3005_v31 = vadd.f32 %v3004_v9, %v2331_v11  ;;  %v2986_v32 = vadd.f32 %v2985_v55, %v2294_v27  ;;  %v3016_v19 = vadd.f32 %v3015_v61, %v2299_v13 }
 0x3d1   : > { %v3011_v39 = vadd.f32 %v3010_v23, %v2330_v5 }
 0x3d2   : > { %v3006_v33 = vadd.f32 %v3005_v31, %v4336_v56  ;;  %v2987_v26 = vadd.f32 %v2986_v32, %v2334_v63  ;;  %v3017_v3 = vadd.f32 %v3016_v19, %v2339_v34 }
 0x3d3   : > { %v3012_v35 = vadd.f32 %v3011_v39, %v4336_v56 }
 0x3d4   : > { %v3007_v42 = vadd.f32 %v3006_v33, %v4317_v53  ;;  %v2988_v25 = vadd.f32 %v2987_v26, %v4336_v56  ;;  %v3018_v41 = vadd.f32 %v3017_v3, %v4336_v56 }
 0x3d5   : > { %v3013_v45 = vadd.f32 %v3012_v35, %v4805_v30 }
 0x3d6   : > { %v2989_v22 = vadd.f32 %v2988_v25, %v4310_v49  ;;  %v3019_v8 = vadd.f32 %v3018_v41, %v4804_v18 }
 0x3df   : > { %v2739_v53 = vpop.permute.xlu0 %2738 }
 0x3e0   : > { %v2741_v20 = vadd.f32 %v2965_v29, %v2739_v53  ;;  %v2742_v15 = vadd.f32 %v4806_v12, %v2739_v53  ;;  %v2743_v0 = vadd.f32 %v4807_v36, %v2739_v53  ;;  %v2744_v28 = vadd.f32 %v4644_v48, %v2739_v53 }
 0x3e1   : > { %v2745_v56 = vadd.f32 %v2989_v22, %v2739_v53  ;;  %v2746_v52 = vadd.f32 %v4641_v6, %v2739_v53  ;;  %v2747_v49 = vadd.f32 %v4625_v46, %v2739_v53  ;;  %v2748_v10 = vadd.f32 %v3007_v42, %v2739_v53 }
 0x3e2   : > { %v2749_v17 = vadd.f32 %v3013_v45, %v2739_v53  ;;  %v2750_v14 = vadd.f32 %v3019_v8, %v2739_v53  ;;  %2751 = vst [vmem:[%s305_s16] sm:$0xff] %v2741_v20  ;;  %2752 = vst [vmem:[%s305_s16 + $0x8] sm:$0xff] %v2742_v15 }
 0x3e3   : > { %2753 = vst [vmem:[%s305_s16 + $0x10] sm:$0xff] %v2743_v0  ;;  %2754 = vst [vmem:[%s305_s16 + $0x18] sm:$0xff] %v2744_v28 }
 0x3e4   : > { %2755 = vst [vmem:[%s305_s16 + $0x20] sm:$0xff] %v2745_v56  ;;  %2756 = vst [vmem:[%s305_s16 + $0x28] sm:$0xff] %v2746_v52 }
 0x3e5   : > { %2757 = vst [vmem:[%s305_s16 + $0x30] sm:$0xff] %v2747_v49  ;;  %2758 = vst [vmem:[%s305_s16 + $0x38] sm:$0xff] %v2748_v10 }
 0x3e6   : > { %2759 = vst [vmem:[%s305_s16 + $0x40] sm:$0xff] %v2749_v17  ;;  %2760 = vst [vmem:[%s305_s16 + $0x48] sm:$0xff] %v2750_v14 }
 0x3e7 PF: > { %s18_s27 = sadd.s32 1, %s3074_s27  }
 0x3e8   : > { %p15_p4 = scmp.ge.s32.totalorder %s18_s27, 4  }
 0x3ea   :  { %17 = sbr.rel (!%p15_p4) target bundleno = 1 (0x1), region = 82 }

</bundles_post_ra>
